<compile_context>
chip_gen: v6e
topology: v6e:2x2x1
jax: 0.10.0
libtpu: 0.0.40
codegen_flags: <defaults>
</compile_context>

<pallas_src>
import jax
import jax.numpy as jnp
from jax.experimental import pallas as pl
from jax.experimental.pallas import tpu as pltpu

IMG_LEN = 1024
TXT_LEN = 300
N_CLASSES = 50
D = 128

NC_PAD = 128                    # 50 classes padded to one full lane group
NUM_HEADS = 3
OUT_COLS = NUM_HEADS * NC_PAD   # fused output width: 3 x 128 lanes
NEG_INF = -1e30                 # padded-class bias; exp() underflows to 0 in f32
BN_EPS = 1e-5


def _trident_kernel(img_ref, txt_ref,
                    w_i1, b_i1, w_i2, b_i2,
                    w_t1, b_t1, w_t2, b_t2,
                    w1a, w1b, b1, w2, b2,
                    w_o, b_o, w_oi, b_oi, w_ot, b_ot,
                    out_ref):
    f32 = jnp.float32
    bf16 = jnp.bfloat16

    def dense(x, w, b):
        # bf16 MXU operands, f32 accumulation, f32 bias add.
        return jnp.dot(x.astype(bf16), w[...],
                       preferred_element_type=f32) + b[...]

    def dense_relu(x, w, b):
        return jnp.maximum(dense(x, w, b), 0.0)

    def log_softmax_head(x, w, b):
        z = dense(x, w, b)                                # (TB, 128) f32
        m = jnp.max(z, axis=-1, keepdims=True)
        e = jnp.exp(z - m)
        return z - m - jnp.log(jnp.sum(e, axis=-1, keepdims=True))

    # Image tower (each eval-mode BN folded into the next layer's weights).
    a_img1 = dense_relu(img_ref[...], w_i1, b_i1)         # (TB, 512)
    a_img2 = dense_relu(a_img1, w_i2, b_i2)               # (TB, 256)
    # Text tower (native 300-wide contracting dim, Mosaic handles K=300).
    a_txt1 = dense_relu(txt_ref[...], w_t1, b_t1)         # (TB, 256)
    a_txt2 = dense_relu(a_txt1, w_t2, b_t2)               # (TB, 256)

    # Trunk: concat(x_img, x_txt) @ W_fc1 as two accumulated matmuls.
    h1 = jnp.maximum(
        jnp.dot(a_img2.astype(bf16), w1a[...], preferred_element_type=f32)
        + jnp.dot(a_txt2.astype(bf16), w1b[...], preferred_element_type=f32)
        + b1[...], 0.0)                                   # (TB, 128)
    h2 = dense_relu(h1, w2, b2)                           # (TB, 128)

    # Fused lane-dense output: heads at lane offsets 0 / 128 / 256.
    out_ref[:, 0 * NC_PAD:1 * NC_PAD] = log_softmax_head(h2, w_o, b_o)
    out_ref[:, 1 * NC_PAD:2 * NC_PAD] = log_softmax_head(a_img2, w_oi, b_oi)
    out_ref[:, 2 * NC_PAD:3 * NC_PAD] = log_softmax_head(a_txt2, w_ot, b_ot)


def prepare_params(p):
    """One-time prep: transpose Linear weights to (in, out), fold every
    eval-mode BatchNorm into the downstream Linear, pad the class dim to 128
    lanes, and store matmul weights in bf16 (biases stay f32)."""
    def wt(name):
        return p[name + "_w"].T.astype(jnp.float32)       # (in, out)

    def bias(name):
        return p[name + "_b"].astype(jnp.float32)

    def bn_scale_shift(name):
        s = p[name + "_gamma"] / jnp.sqrt(p[name + "_var"] + BN_EPS)
        t = p[name + "_beta"] - p[name + "_mean"] * s
        return s, t

    s_i1, t_i1 = bn_scale_shift("bn_img_1")
    s_i2, t_i2 = bn_scale_shift("bn_img_2")
    s_t1, t_t1 = bn_scale_shift("bn_txt_1")
    s_t2, t_t2 = bn_scale_shift("bn_txt_2")
    s_1, t_1 = bn_scale_shift("bn1")
    s_2, t_2 = bn_scale_shift("bn2")

    # Image tower.
    w_i1 = wt("fc_img_1")                                  # (1024, 512)
    b_i1 = bias("fc_img_1")
    w_fc_img_2 = wt("fc_img_2")
    w_i2 = s_i1[:, None] * w_fc_img_2                      # bn_img_1 folded in
    b_i2 = bias("fc_img_2") + t_i1 @ w_fc_img_2

    # Text tower (contracting dim stays at its native 300).
    w_t1 = wt("fc_txt_1")                                  # (300, 256)
    b_t1 = bias("fc_txt_1")
    w_fc_txt_2 = wt("fc_txt_2")
    w_t2 = s_t1[:, None] * w_fc_txt_2                      # bn_txt_1 folded in
    b_t2 = bias("fc_txt_2") + t_t1 @ w_fc_txt_2

    # Trunk: fc1 acts on concat(x_img, x_txt) -> split into img/txt halves and
    # fold bn_img_2 / bn_txt_2 into the respective halves.
    w_fc1 = wt("fc1")                                      # (512, 128)
    w1a = s_i2[:, None] * w_fc1[:2 * D]
    w1b = s_t2[:, None] * w_fc1[2 * D:]
    b1 = bias("fc1") + t_i2 @ w_fc1[:2 * D] + t_t2 @ w_fc1[2 * D:]
    w_fc2 = wt("fc2")
    w2 = s_1[:, None] * w_fc2                              # bn1 folded in
    b2 = bias("fc2") + t_1 @ w_fc2

    def pad_head(w, b):
        # Pad class dim 50 -> 128: zero weight columns, -1e30 bias so the
        # 128-lane in-kernel log-softmax equals log-softmax over the 50 classes.
        wp = jnp.zeros((w.shape[0], NC_PAD), jnp.float32).at[:, :N_CLASSES].set(w)
        bp = jnp.full((NC_PAD,), NEG_INF, jnp.float32).at[:N_CLASSES].set(b)
        return wp, bp

    w_out = wt("out")
    w_out_img = wt("out_img")
    w_out_txt = wt("out_txt")
    w_o, b_o = pad_head(s_2[:, None] * w_out,              # bn2 folded in
                        bias("out") + t_2 @ w_out)
    w_oi, b_oi = pad_head(s_i2[:, None] * w_out_img,       # bn_img_2 folded in
                          bias("out_img") + t_i2 @ w_out_img)
    w_ot, b_ot = pad_head(s_t2[:, None] * w_out_txt,       # bn_txt_2 folded in
                          bias("out_txt") + t_t2 @ w_out_txt)

    def w16(w):
        return w.astype(jnp.bfloat16)                      # MXU-native operand

    def row(b):
        return b.reshape(1, -1).astype(jnp.float32)        # f32 bias row

    return (w16(w_i1), row(b_i1), w16(w_i2), row(b_i2),
            w16(w_t1), row(b_t1), w16(w_t2), row(b_t2),
            w16(w1a), w16(w1b), row(b1), w16(w2), row(b2),
            w16(w_o), row(b_o), w16(w_oi), row(b_oi), w16(w_ot), row(b_ot))


def _round_up(x, m):
    return ((x + m - 1) // m) * m


def trident_forward(inp_img, inp_txt, weights, *, block_b=512):
    batch = inp_img.shape[0]
    # Clamp the batch tile to the real batch (multiple of 8 for the sublane dim).
    block_b = max(8, min(_round_up(block_b, 8), _round_up(batch, 8)))
    # Keep >=2 grid steps when there is enough work so both v7x TCs engage.
    if batch >= 16 and pl.cdiv(batch, block_b) < 2:
        block_b = max(8, _round_up(pl.cdiv(batch, 2), 8))
    grid = (pl.cdiv(batch, block_b),)

    weight_bytes = int(sum(int(w.size) * w.dtype.itemsize for w in weights))
    flops_per_row = 2 * (IMG_LEN * 4 * D + 4 * D * 2 * D        # image tower
                         + TXT_LEN * 2 * D + 2 * D * 2 * D      # text tower
                         + 2 * (2 * D * D) + D * D              # trunk
                         + (D + 2 * D + 2 * D) * NC_PAD)        # heads
    cost = pl.CostEstimate(
        flops=int(batch * flops_per_row),
        transcendentals=int(batch * (NUM_HEADS * NC_PAD + NUM_HEADS)),
        bytes_accessed=int(batch * (IMG_LEN + TXT_LEN + OUT_COLS) * 4
                           + weight_bytes))

    # Weights/biases: whole-array resident in VMEM, fetched once (no per-step
    # double-buffering). Activations: batch-tiled, auto-pipelined.
    resident = pl.BlockSpec(memory_space=pltpu.MemorySpace.VMEM)
    fused = pl.pallas_call(
        _trident_kernel,
        grid=grid,
        in_specs=[pl.BlockSpec((block_b, IMG_LEN), lambda i: (i, 0)),
                  pl.BlockSpec((block_b, TXT_LEN), lambda i: (i, 0))]
                 + [resident] * len(weights),
        out_specs=pl.BlockSpec((block_b, OUT_COLS), lambda i: (i, 0)),
        out_shape=jax.ShapeDtypeStruct((batch, OUT_COLS), jnp.float32),
        compiler_params=pltpu.CompilerParams(
            dimension_semantics=("parallel",),
            vmem_limit_bytes=48 * 1024 * 1024),
        cost_estimate=cost,
    )(inp_img, inp_txt, *weights)

    return (fused[:, 0 * NC_PAD:0 * NC_PAD + N_CLASSES],
            fused[:, 1 * NC_PAD:1 * NC_PAD + N_CLASSES],
            fused[:, 2 * NC_PAD:2 * NC_PAD + N_CLASSES])


def init_params(key, d=D):
    layers = {
        "fc_img_1": (IMG_LEN, 4 * d),
        "fc_img_2": (4 * d, 2 * d),
        "fc_txt_1": (TXT_LEN, 2 * d),
        "fc_txt_2": (2 * d, 2 * d),
        "fc1": (4 * d, d),
        "fc2": (d, d),
        "out": (d, N_CLASSES),
        "out_img": (2 * d, N_CLASSES),
        "out_txt": (2 * d, N_CLASSES),
    }
    bns = {"bn_img_1": 4 * d, "bn_img_2": 2 * d, "bn_txt_1": 2 * d,
           "bn_txt_2": 2 * d, "bn1": d, "bn2": d}
    params = {}
    keys = iter(jax.random.split(key, 2 * len(layers) + 4 * len(bns)))
    for name, (fan_in, fan_out) in layers.items():
        bound = 1.0 / (fan_in ** 0.5)
        params[name + "_w"] = jax.random.uniform(
            next(keys), (fan_out, fan_in), jnp.float32, -bound, bound)
        params[name + "_b"] = jax.random.uniform(
            next(keys), (fan_out,), jnp.float32, -bound, bound)
    for name, n in bns.items():
        params[name + "_gamma"] = jax.random.uniform(next(keys), (n,), jnp.float32, 0.5, 1.5)
        params[name + "_beta"] = jax.random.uniform(next(keys), (n,), jnp.float32, -0.5, 0.5)
        params[name + "_mean"] = 0.1 * jax.random.normal(next(keys), (n,), jnp.float32)
        params[name + "_var"] = jax.random.uniform(next(keys), (n,), jnp.float32, 0.5, 1.5)
    return params


def reference_forward(inp_img, inp_txt, p):
    """Pure-JAX (f32) mirror of NormModelTridentBN.forward (eval mode)."""
    def lin(name, x):
        return x @ p[name + "_w"].T + p[name + "_b"]

    def bn(name, x):
        inv = 1.0 / jnp.sqrt(p[name + "_var"] + BN_EPS)
        return (x - p[name + "_mean"]) * inv * p[name + "_gamma"] + p[name + "_beta"]

    x_img = bn("bn_img_1", jax.nn.relu(lin("fc_img_1", inp_img)))
    x_img = bn("bn_img_2", jax.nn.relu(lin("fc_img_2", x_img)))
    x_txt = bn("bn_txt_1", jax.nn.relu(lin("fc_txt_1", inp_txt)))
    x_txt = bn("bn_txt_2", jax.nn.relu(lin("fc_txt_2", x_txt)))
    x = jnp.concatenate([x_img, x_txt], axis=1)
    x = bn("bn1", jax.nn.relu(lin("fc1", x)))
    x = bn("bn2", jax.nn.relu(lin("fc2", x)))
    out = jax.nn.log_softmax(lin("out", x), axis=1)
    out_img = jax.nn.log_softmax(lin("out_img", x_img), axis=1)
    out_txt = jax.nn.log_softmax(lin("out_txt", x_txt), axis=1)
    return out, out_img, out_txt


if __name__ == "__main__":
    batch = 8
    key = jax.random.PRNGKey(0)
    k_img, k_txt, k_p = jax.random.split(key, 3)
    inp_img = jax.random.normal(k_img, (batch, IMG_LEN), jnp.float32)
    inp_txt = jax.random.normal(k_txt, (batch, TXT_LEN), jnp.float32)

    params = init_params(k_p)
    weights = prepare_params(params)    # one-time: transpose + BN-fold + bf16

    outs = trident_forward(inp_img, inp_txt, weights)
    outs = jax.block_until_ready(outs)

    refs = reference_forward(inp_img, inp_txt, params)
    for name, got, ref in zip(("out", "out_img", "out_txt"), outs, refs):
        assert got.shape == (batch, N_CLASSES), (name, got.shape)
        # bf16 matmul operands vs. the pure-f32 reference -> loosened tolerance.
        err = float(jnp.max(jnp.abs(got - ref)))
        assert err < 1e-1, (name, err)
    print("KERNEL_OK")
</pallas_src>

<mosaic_0001>
module attributes {stable_mosaic.version = 11 : i64} {
  func.func @_trident_kernel(%arg0: i32, %arg1: memref<8x1024xf32, #tpu.memory_space<vmem>>, %arg2: memref<8x300xf32, #tpu.memory_space<vmem>>, %arg3: memref<1024x512xbf16, #tpu.memory_space<vmem>>, %arg4: memref<1x512xf32, #tpu.memory_space<vmem>>, %arg5: memref<512x256xbf16, #tpu.memory_space<vmem>>, %arg6: memref<1x256xf32, #tpu.memory_space<vmem>>, %arg7: memref<300x256xbf16, #tpu.memory_space<vmem>>, %arg8: memref<1x256xf32, #tpu.memory_space<vmem>>, %arg9: memref<256x256xbf16, #tpu.memory_space<vmem>>, %arg10: memref<1x256xf32, #tpu.memory_space<vmem>>, %arg11: memref<256x128xbf16, #tpu.memory_space<vmem>>, %arg12: memref<256x128xbf16, #tpu.memory_space<vmem>>, %arg13: memref<1x128xf32, #tpu.memory_space<vmem>>, %arg14: memref<128x128xbf16, #tpu.memory_space<vmem>>, %arg15: memref<1x128xf32, #tpu.memory_space<vmem>>, %arg16: memref<128x128xbf16, #tpu.memory_space<vmem>>, %arg17: memref<1x128xf32, #tpu.memory_space<vmem>>, %arg18: memref<256x128xbf16, #tpu.memory_space<vmem>>, %arg19: memref<1x128xf32, #tpu.memory_space<vmem>>, %arg20: memref<256x128xbf16, #tpu.memory_space<vmem>>, %arg21: memref<1x128xf32, #tpu.memory_space<vmem>>, %arg22: memref<8x384xf32, #tpu.memory_space<vmem>>) attributes {dimension_semantics = [#tpu.dimension_semantics<parallel>], iteration_bounds = array<i64: 1>, scalar_prefetch = 0 : i64, scratch_operands = 0 : i64, tpu.core_type = #tpu.core_type<tc>, window_params = [{transform_indices = @transform_0, window_bounds = array<i64: 8, 1024>}, {transform_indices = @transform_1, window_bounds = array<i64: 8, 300>}, {pipeline_mode = #tpu.pipeline_mode<synchronous>, transform_indices = @transform_2, window_bounds = array<i64: 1024, 512>}, {pipeline_mode = #tpu.pipeline_mode<synchronous>, transform_indices = @transform_3, window_bounds = array<i64: 1, 512>}, {pipeline_mode = #tpu.pipeline_mode<synchronous>, transform_indices = @transform_4, window_bounds = array<i64: 512, 256>}, {pipeline_mode = #tpu.pipeline_mode<synchronous>, transform_indices = @transform_5, window_bounds = array<i64: 1, 256>}, {pipeline_mode = #tpu.pipeline_mode<synchronous>, transform_indices = @transform_6, window_bounds = array<i64: 300, 256>}, {pipeline_mode = #tpu.pipeline_mode<synchronous>, transform_indices = @transform_7, window_bounds = array<i64: 1, 256>}, {pipeline_mode = #tpu.pipeline_mode<synchronous>, transform_indices = @transform_8, window_bounds = array<i64: 256, 256>}, {pipeline_mode = #tpu.pipeline_mode<synchronous>, transform_indices = @transform_9, window_bounds = array<i64: 1, 256>}, {pipeline_mode = #tpu.pipeline_mode<synchronous>, transform_indices = @transform_10, window_bounds = array<i64: 256, 128>}, {pipeline_mode = #tpu.pipeline_mode<synchronous>, transform_indices = @transform_11, window_bounds = array<i64: 256, 128>}, {pipeline_mode = #tpu.pipeline_mode<synchronous>, transform_indices = @transform_12, window_bounds = array<i64: 1, 128>}, {pipeline_mode = #tpu.pipeline_mode<synchronous>, transform_indices = @transform_13, window_bounds = array<i64: 128, 128>}, {pipeline_mode = #tpu.pipeline_mode<synchronous>, transform_indices = @transform_14, window_bounds = array<i64: 1, 128>}, {pipeline_mode = #tpu.pipeline_mode<synchronous>, transform_indices = @transform_15, window_bounds = array<i64: 128, 128>}, {pipeline_mode = #tpu.pipeline_mode<synchronous>, transform_indices = @transform_16, window_bounds = array<i64: 1, 128>}, {pipeline_mode = #tpu.pipeline_mode<synchronous>, transform_indices = @transform_17, window_bounds = array<i64: 256, 128>}, {pipeline_mode = #tpu.pipeline_mode<synchronous>, transform_indices = @transform_18, window_bounds = array<i64: 1, 128>}, {pipeline_mode = #tpu.pipeline_mode<synchronous>, transform_indices = @transform_19, window_bounds = array<i64: 256, 128>}, {pipeline_mode = #tpu.pipeline_mode<synchronous>, transform_indices = @transform_20, window_bounds = array<i64: 1, 128>}, {transform_indices = @transform_21, window_bounds = array<i64: 8, 384>}]} {
    %c0 = arith.constant 0 : index
    %c0_0 = arith.constant 0 : index
    %0 = vector.load %arg1[%c0, %c0_0] : memref<8x1024xf32, #tpu.memory_space<vmem>>, vector<8x1024xf32>
    %1 = arith.truncf %0 : vector<8x1024xf32> to vector<8x1024xbf16>
    %c0_1 = arith.constant 0 : index
    %c0_2 = arith.constant 0 : index
    %2 = vector.load %arg3[%c0_1, %c0_2] : memref<1024x512xbf16, #tpu.memory_space<vmem>>, vector<1024x512xbf16>
    %cst = arith.constant dense<0.000000e+00> : vector<8x512xf32>
    %3 = tpu.matmul %1, %2, %cst {dimension_numbers = #tpu.dot_dimension_numbers<[1], [0], [0], [1], [0, 0, 1, 1], [], []>} : vector<8x1024xbf16>, vector<1024x512xbf16>, vector<8x512xf32> -> vector<8x512xf32>
    %c0_3 = arith.constant 0 : index
    %c0_4 = arith.constant 0 : index
    %4 = vector.load %arg4[%c0_3, %c0_4] : memref<1x512xf32, #tpu.memory_space<vmem>>, vector<1x512xf32>
    %5 = vector.broadcast %4 : vector<1x512xf32> to vector<8x512xf32>
    %6 = arith.addf %3, %5 : vector<8x512xf32>
    %cst_5 = arith.constant 0.000000e+00 : f32
    %7 = vector.broadcast %cst_5 : f32 to vector<8x512xf32>
    %8 = arith.maximumf %6, %7 : vector<8x512xf32>
    %9 = arith.truncf %8 : vector<8x512xf32> to vector<8x512xbf16>
    %c0_6 = arith.constant 0 : index
    %c0_7 = arith.constant 0 : index
    %10 = vector.load %arg5[%c0_6, %c0_7] : memref<512x256xbf16, #tpu.memory_space<vmem>>, vector<512x256xbf16>
    %cst_8 = arith.constant dense<0.000000e+00> : vector<8x256xf32>
    %11 = tpu.matmul %9, %10, %cst_8 {dimension_numbers = #tpu.dot_dimension_numbers<[1], [0], [0], [1], [0, 0, 1, 1], [], []>} : vector<8x512xbf16>, vector<512x256xbf16>, vector<8x256xf32> -> vector<8x256xf32>
    %c0_9 = arith.constant 0 : index
    %c0_10 = arith.constant 0 : index
    %12 = vector.load %arg6[%c0_9, %c0_10] : memref<1x256xf32, #tpu.memory_space<vmem>>, vector<1x256xf32>
    %13 = vector.broadcast %12 : vector<1x256xf32> to vector<8x256xf32>
    %14 = arith.addf %11, %13 : vector<8x256xf32>
    %cst_11 = arith.constant 0.000000e+00 : f32
    %15 = vector.broadcast %cst_11 : f32 to vector<8x256xf32>
    %16 = arith.maximumf %14, %15 : vector<8x256xf32>
    %c0_12 = arith.constant 0 : index
    %c0_13 = arith.constant 0 : index
    %17 = vector.load %arg2[%c0_12, %c0_13] : memref<8x300xf32, #tpu.memory_space<vmem>>, vector<8x300xf32>
    %18 = arith.truncf %17 : vector<8x300xf32> to vector<8x300xbf16>
    %c0_14 = arith.constant 0 : index
    %c0_15 = arith.constant 0 : index
    %19 = vector.load %arg7[%c0_14, %c0_15] : memref<300x256xbf16, #tpu.memory_space<vmem>>, vector<300x256xbf16>
    %cst_16 = arith.constant dense<0.000000e+00> : vector<8x256xf32>
    %20 = tpu.matmul %18, %19, %cst_16 {dimension_numbers = #tpu.dot_dimension_numbers<[1], [0], [0], [1], [0, 0, 1, 1], [], []>} : vector<8x300xbf16>, vector<300x256xbf16>, vector<8x256xf32> -> vector<8x256xf32>
    %c0_17 = arith.constant 0 : index
    %c0_18 = arith.constant 0 : index
    %21 = vector.load %arg8[%c0_17, %c0_18] : memref<1x256xf32, #tpu.memory_space<vmem>>, vector<1x256xf32>
    %22 = vector.broadcast %21 : vector<1x256xf32> to vector<8x256xf32>
    %23 = arith.addf %20, %22 : vector<8x256xf32>
    %cst_19 = arith.constant 0.000000e+00 : f32
    %24 = vector.broadcast %cst_19 : f32 to vector<8x256xf32>
    %25 = arith.maximumf %23, %24 : vector<8x256xf32>
    %26 = arith.truncf %25 : vector<8x256xf32> to vector<8x256xbf16>
    %c0_20 = arith.constant 0 : index
    %c0_21 = arith.constant 0 : index
    %27 = vector.load %arg9[%c0_20, %c0_21] : memref<256x256xbf16, #tpu.memory_space<vmem>>, vector<256x256xbf16>
    %cst_22 = arith.constant dense<0.000000e+00> : vector<8x256xf32>
    %28 = tpu.matmul %26, %27, %cst_22 {dimension_numbers = #tpu.dot_dimension_numbers<[1], [0], [0], [1], [0, 0, 1, 1], [], []>} : vector<8x256xbf16>, vector<256x256xbf16>, vector<8x256xf32> -> vector<8x256xf32>
    %c0_23 = arith.constant 0 : index
    %c0_24 = arith.constant 0 : index
    %29 = vector.load %arg10[%c0_23, %c0_24] : memref<1x256xf32, #tpu.memory_space<vmem>>, vector<1x256xf32>
    %30 = vector.broadcast %29 : vector<1x256xf32> to vector<8x256xf32>
    %31 = arith.addf %28, %30 : vector<8x256xf32>
    %cst_25 = arith.constant 0.000000e+00 : f32
    %32 = vector.broadcast %cst_25 : f32 to vector<8x256xf32>
    %33 = arith.maximumf %31, %32 : vector<8x256xf32>
    %34 = arith.truncf %16 : vector<8x256xf32> to vector<8x256xbf16>
    %c0_26 = arith.constant 0 : index
    %c0_27 = arith.constant 0 : index
    %35 = vector.load %arg11[%c0_26, %c0_27] : memref<256x128xbf16, #tpu.memory_space<vmem>>, vector<256x128xbf16>
    %cst_28 = arith.constant dense<0.000000e+00> : vector<8x128xf32>
    %36 = tpu.matmul %34, %35, %cst_28 {dimension_numbers = #tpu.dot_dimension_numbers<[1], [0], [0], [1], [0, 0, 1, 1], [], []>} : vector<8x256xbf16>, vector<256x128xbf16>, vector<8x128xf32> -> vector<8x128xf32>
    %37 = arith.truncf %33 : vector<8x256xf32> to vector<8x256xbf16>
    %c0_29 = arith.constant 0 : index
    %c0_30 = arith.constant 0 : index
    %38 = vector.load %arg12[%c0_29, %c0_30] : memref<256x128xbf16, #tpu.memory_space<vmem>>, vector<256x128xbf16>
    %cst_31 = arith.constant dense<0.000000e+00> : vector<8x128xf32>
    %39 = tpu.matmul %37, %38, %cst_31 {dimension_numbers = #tpu.dot_dimension_numbers<[1], [0], [0], [1], [0, 0, 1, 1], [], []>} : vector<8x256xbf16>, vector<256x128xbf16>, vector<8x128xf32> -> vector<8x128xf32>
    %40 = arith.addf %36, %39 : vector<8x128xf32>
    %c0_32 = arith.constant 0 : index
    %c0_33 = arith.constant 0 : index
    %41 = vector.load %arg13[%c0_32, %c0_33] : memref<1x128xf32, #tpu.memory_space<vmem>>, vector<1x128xf32>
    %42 = vector.broadcast %41 : vector<1x128xf32> to vector<8x128xf32>
    %43 = arith.addf %40, %42 : vector<8x128xf32>
    %cst_34 = arith.constant 0.000000e+00 : f32
    %44 = vector.broadcast %cst_34 : f32 to vector<8x128xf32>
    %45 = arith.maximumf %43, %44 : vector<8x128xf32>
    %46 = arith.truncf %45 : vector<8x128xf32> to vector<8x128xbf16>
    %c0_35 = arith.constant 0 : index
    %c0_36 = arith.constant 0 : index
    %47 = vector.load %arg14[%c0_35, %c0_36] : memref<128x128xbf16, #tpu.memory_space<vmem>>, vector<128x128xbf16>
    %cst_37 = arith.constant dense<0.000000e+00> : vector<8x128xf32>
    %48 = tpu.matmul %46, %47, %cst_37 {dimension_numbers = #tpu.dot_dimension_numbers<[1], [0], [0], [1], [0, 0, 1, 1], [], []>} : vector<8x128xbf16>, vector<128x128xbf16>, vector<8x128xf32> -> vector<8x128xf32>
    %c0_38 = arith.constant 0 : index
    %c0_39 = arith.constant 0 : index
    %49 = vector.load %arg15[%c0_38, %c0_39] : memref<1x128xf32, #tpu.memory_space<vmem>>, vector<1x128xf32>
    %50 = vector.broadcast %49 : vector<1x128xf32> to vector<8x128xf32>
    %51 = arith.addf %48, %50 : vector<8x128xf32>
    %cst_40 = arith.constant 0.000000e+00 : f32
    %52 = vector.broadcast %cst_40 : f32 to vector<8x128xf32>
    %53 = arith.maximumf %51, %52 : vector<8x128xf32>
    %54 = arith.truncf %53 : vector<8x128xf32> to vector<8x128xbf16>
    %c0_41 = arith.constant 0 : index
    %c0_42 = arith.constant 0 : index
    %55 = vector.load %arg16[%c0_41, %c0_42] : memref<128x128xbf16, #tpu.memory_space<vmem>>, vector<128x128xbf16>
    %cst_43 = arith.constant dense<0.000000e+00> : vector<8x128xf32>
    %56 = tpu.matmul %54, %55, %cst_43 {dimension_numbers = #tpu.dot_dimension_numbers<[1], [0], [0], [1], [0, 0, 1, 1], [], []>} : vector<8x128xbf16>, vector<128x128xbf16>, vector<8x128xf32> -> vector<8x128xf32>
    %c0_44 = arith.constant 0 : index
    %c0_45 = arith.constant 0 : index
    %57 = vector.load %arg17[%c0_44, %c0_45] : memref<1x128xf32, #tpu.memory_space<vmem>>, vector<1x128xf32>
    %58 = vector.broadcast %57 : vector<1x128xf32> to vector<8x128xf32>
    %59 = arith.addf %56, %58 : vector<8x128xf32>
    %cst_46 = arith.constant dense<0xFF800000> : vector<8xf32>
    %60 = vector.multi_reduction <maximumf>, %59, %cst_46 [1] : vector<8x128xf32> to vector<8xf32>
    %61 = vector.shape_cast %60 : vector<8xf32> to vector<8x1xf32>
    %62 = vector.broadcast %61 : vector<8x1xf32> to vector<8x128xf32>
    %63 = arith.subf %59, %62 : vector<8x128xf32>
    %64 = math.exp %63 : vector<8x128xf32>
    %65 = vector.broadcast %61 : vector<8x1xf32> to vector<8x128xf32>
    %66 = arith.subf %59, %65 : vector<8x128xf32>
    %cst_47 = arith.constant dense<0.000000e+00> : vector<8xf32>
    %67 = vector.multi_reduction <add>, %64, %cst_47 [1] : vector<8x128xf32> to vector<8xf32>
    %68 = vector.shape_cast %67 : vector<8xf32> to vector<8x1xf32>
    %69 = math.log %68 : vector<8x1xf32>
    %70 = vector.broadcast %69 : vector<8x1xf32> to vector<8x128xf32>
    %71 = arith.subf %66, %70 : vector<8x128xf32>
    %c0_48 = arith.constant 0 : index
    %c0_49 = arith.constant 0 : index
    %72 = vector.load %arg22[%c0_48, %c0_49] : memref<8x384xf32, #tpu.memory_space<vmem>>, vector<8x128xf32>
    tpu.vector_store %arg22[%c0_48, %c0_49], %71 {strides = array<i32>} : memref<8x384xf32, #tpu.memory_space<vmem>>, vector<8x128xf32>,
    %73 = arith.truncf %16 : vector<8x256xf32> to vector<8x256xbf16>
    %c0_50 = arith.constant 0 : index
    %c0_51 = arith.constant 0 : index
    %74 = vector.load %arg18[%c0_50, %c0_51] : memref<256x128xbf16, #tpu.memory_space<vmem>>, vector<256x128xbf16>
    %cst_52 = arith.constant dense<0.000000e+00> : vector<8x128xf32>
    %75 = tpu.matmul %73, %74, %cst_52 {dimension_numbers = #tpu.dot_dimension_numbers<[1], [0], [0], [1], [0, 0, 1, 1], [], []>} : vector<8x256xbf16>, vector<256x128xbf16>, vector<8x128xf32> -> vector<8x128xf32>
    %c0_53 = arith.constant 0 : index
    %c0_54 = arith.constant 0 : index
    %76 = vector.load %arg19[%c0_53, %c0_54] : memref<1x128xf32, #tpu.memory_space<vmem>>, vector<1x128xf32>
    %77 = vector.broadcast %76 : vector<1x128xf32> to vector<8x128xf32>
    %78 = arith.addf %75, %77 : vector<8x128xf32>
    %cst_55 = arith.constant dense<0xFF800000> : vector<8xf32>
    %79 = vector.multi_reduction <maximumf>, %78, %cst_55 [1] : vector<8x128xf32> to vector<8xf32>
    %80 = vector.shape_cast %79 : vector<8xf32> to vector<8x1xf32>
    %81 = vector.broadcast %80 : vector<8x1xf32> to vector<8x128xf32>
    %82 = arith.subf %78, %81 : vector<8x128xf32>
    %83 = math.exp %82 : vector<8x128xf32>
    %84 = vector.broadcast %80 : vector<8x1xf32> to vector<8x128xf32>
    %85 = arith.subf %78, %84 : vector<8x128xf32>
    %cst_56 = arith.constant dense<0.000000e+00> : vector<8xf32>
    %86 = vector.multi_reduction <add>, %83, %cst_56 [1] : vector<8x128xf32> to vector<8xf32>
    %87 = vector.shape_cast %86 : vector<8xf32> to vector<8x1xf32>
    %88 = math.log %87 : vector<8x1xf32>
    %89 = vector.broadcast %88 : vector<8x1xf32> to vector<8x128xf32>
    %90 = arith.subf %85, %89 : vector<8x128xf32>
    %c0_57 = arith.constant 0 : index
    %c128 = arith.constant 128 : index
    %91 = vector.load %arg22[%c0_57, %c128] : memref<8x384xf32, #tpu.memory_space<vmem>>, vector<8x128xf32>
    tpu.vector_store %arg22[%c0_57, %c128], %90 {strides = array<i32>} : memref<8x384xf32, #tpu.memory_space<vmem>>, vector<8x128xf32>,
    %92 = arith.truncf %33 : vector<8x256xf32> to vector<8x256xbf16>
    %c0_58 = arith.constant 0 : index
    %c0_59 = arith.constant 0 : index
    %93 = vector.load %arg20[%c0_58, %c0_59] : memref<256x128xbf16, #tpu.memory_space<vmem>>, vector<256x128xbf16>
    %cst_60 = arith.constant dense<0.000000e+00> : vector<8x128xf32>
    %94 = tpu.matmul %92, %93, %cst_60 {dimension_numbers = #tpu.dot_dimension_numbers<[1], [0], [0], [1], [0, 0, 1, 1], [], []>} : vector<8x256xbf16>, vector<256x128xbf16>, vector<8x128xf32> -> vector<8x128xf32>
    %c0_61 = arith.constant 0 : index
    %c0_62 = arith.constant 0 : index
    %95 = vector.load %arg21[%c0_61, %c0_62] : memref<1x128xf32, #tpu.memory_space<vmem>>, vector<1x128xf32>
    %96 = vector.broadcast %95 : vector<1x128xf32> to vector<8x128xf32>
    %97 = arith.addf %94, %96 : vector<8x128xf32>
    %cst_63 = arith.constant dense<0xFF800000> : vector<8xf32>
    %98 = vector.multi_reduction <maximumf>, %97, %cst_63 [1] : vector<8x128xf32> to vector<8xf32>
    %99 = vector.shape_cast %98 : vector<8xf32> to vector<8x1xf32>
    %100 = vector.broadcast %99 : vector<8x1xf32> to vector<8x128xf32>
    %101 = arith.subf %97, %100 : vector<8x128xf32>
    %102 = math.exp %101 : vector<8x128xf32>
    %103 = vector.broadcast %99 : vector<8x1xf32> to vector<8x128xf32>
    %104 = arith.subf %97, %103 : vector<8x128xf32>
    %cst_64 = arith.constant dense<0.000000e+00> : vector<8xf32>
    %105 = vector.multi_reduction <add>, %102, %cst_64 [1] : vector<8x128xf32> to vector<8xf32>
    %106 = vector.shape_cast %105 : vector<8xf32> to vector<8x1xf32>
    %107 = math.log %106 : vector<8x1xf32>
    %108 = vector.broadcast %107 : vector<8x1xf32> to vector<8x128xf32>
    %109 = arith.subf %104, %108 : vector<8x128xf32>
    %c0_65 = arith.constant 0 : index
    %c256 = arith.constant 256 : index
    %110 = vector.load %arg22[%c0_65, %c256] : memref<8x384xf32, #tpu.memory_space<vmem>>, vector<8x128xf32>
    tpu.vector_store %arg22[%c0_65, %c256], %109 {strides = array<i32>} : memref<8x384xf32, #tpu.memory_space<vmem>>, vector<8x128xf32>,
    return
  }
  func.func @transform_0(%arg0: i32) -> (i32, i32) {
    %c0_i32 = arith.constant 0 : i32
    %c0_i32_0 = arith.constant 0 : i32
    return %arg0, %c0_i32 : i32, i32
  }
  func.func @transform_1(%arg0: i32) -> (i32, i32) {
    %c0_i32 = arith.constant 0 : i32
    %c0_i32_0 = arith.constant 0 : i32
    return %arg0, %c0_i32 : i32, i32
  }
  func.func @transform_2(%arg0: i32) -> (i32, i32) {
    %c0_i32 = arith.constant 0 : i32
    %c0_i32_0 = arith.constant 0 : i32
    %c0_i32_1 = arith.constant 0 : i32
    return %c0_i32, %c0_i32_0 : i32, i32
  }
  func.func @transform_3(%arg0: i32) -> (i32, i32) {
    %c0_i32 = arith.constant 0 : i32
    %c0_i32_0 = arith.constant 0 : i32
    %c0_i32_1 = arith.constant 0 : i32
    return %c0_i32, %c0_i32_0 : i32, i32
  }
  func.func @transform_4(%arg0: i32) -> (i32, i32) {
    %c0_i32 = arith.constant 0 : i32
    %c0_i32_0 = arith.constant 0 : i32
    %c0_i32_1 = arith.constant 0 : i32
    return %c0_i32, %c0_i32_0 : i32, i32
  }
  func.func @transform_5(%arg0: i32) -> (i32, i32) {
    %c0_i32 = arith.constant 0 : i32
    %c0_i32_0 = arith.constant 0 : i32
    %c0_i32_1 = arith.constant 0 : i32
    return %c0_i32, %c0_i32_0 : i32, i32
  }
  func.func @transform_6(%arg0: i32) -> (i32, i32) {
    %c0_i32 = arith.constant 0 : i32
    %c0_i32_0 = arith.constant 0 : i32
    %c0_i32_1 = arith.constant 0 : i32
    return %c0_i32, %c0_i32_0 : i32, i32
  }
  func.func @transform_7(%arg0: i32) -> (i32, i32) {
    %c0_i32 = arith.constant 0 : i32
    %c0_i32_0 = arith.constant 0 : i32
    %c0_i32_1 = arith.constant 0 : i32
    return %c0_i32, %c0_i32_0 : i32, i32
  }
  func.func @transform_8(%arg0: i32) -> (i32, i32) {
    %c0_i32 = arith.constant 0 : i32
    %c0_i32_0 = arith.constant 0 : i32
    %c0_i32_1 = arith.constant 0 : i32
    return %c0_i32, %c0_i32_0 : i32, i32
  }
  func.func @transform_9(%arg0: i32) -> (i32, i32) {
    %c0_i32 = arith.constant 0 : i32
    %c0_i32_0 = arith.constant 0 : i32
    %c0_i32_1 = arith.constant 0 : i32
    return %c0_i32, %c0_i32_0 : i32, i32
  }
  func.func @transform_10(%arg0: i32) -> (i32, i32) {
    %c0_i32 = arith.constant 0 : i32
    %c0_i32_0 = arith.constant 0 : i32
    %c0_i32_1 = arith.constant 0 : i32
    return %c0_i32, %c0_i32_0 : i32, i32
  }
  func.func @transform_11(%arg0: i32) -> (i32, i32) {
    %c0_i32 = arith.constant 0 : i32
    %c0_i32_0 = arith.constant 0 : i32
    %c0_i32_1 = arith.constant 0 : i32
    return %c0_i32, %c0_i32_0 : i32, i32
  }
  func.func @transform_12(%arg0: i32) -> (i32, i32) {
    %c0_i32 = arith.constant 0 : i32
    %c0_i32_0 = arith.constant 0 : i32
    %c0_i32_1 = arith.constant 0 : i32
    return %c0_i32, %c0_i32_0 : i32, i32
  }
  func.func @transform_13(%arg0: i32) -> (i32, i32) {
    %c0_i32 = arith.constant 0 : i32
    %c0_i32_0 = arith.constant 0 : i32
    %c0_i32_1 = arith.constant 0 : i32
    return %c0_i32, %c0_i32_0 : i32, i32
  }
  func.func @transform_14(%arg0: i32) -> (i32, i32) {
    %c0_i32 = arith.constant 0 : i32
    %c0_i32_0 = arith.constant 0 : i32
    %c0_i32_1 = arith.constant 0 : i32
    return %c0_i32, %c0_i32_0 : i32, i32
  }
  func.func @transform_15(%arg0: i32) -> (i32, i32) {
    %c0_i32 = arith.constant 0 : i32
    %c0_i32_0 = arith.constant 0 : i32
    %c0_i32_1 = arith.constant 0 : i32
    return %c0_i32, %c0_i32_0 : i32, i32
  }
  func.func @transform_16(%arg0: i32) -> (i32, i32) {
    %c0_i32 = arith.constant 0 : i32
    %c0_i32_0 = arith.constant 0 : i32
    %c0_i32_1 = arith.constant 0 : i32
    return %c0_i32, %c0_i32_0 : i32, i32
  }
  func.func @transform_17(%arg0: i32) -> (i32, i32) {
    %c0_i32 = arith.constant 0 : i32
    %c0_i32_0 = arith.constant 0 : i32
    %c0_i32_1 = arith.constant 0 : i32
    return %c0_i32, %c0_i32_0 : i32, i32
  }
  func.func @transform_18(%arg0: i32) -> (i32, i32) {
    %c0_i32 = arith.constant 0 : i32
    %c0_i32_0 = arith.constant 0 : i32
    %c0_i32_1 = arith.constant 0 : i32
    return %c0_i32, %c0_i32_0 : i32, i32
  }
  func.func @transform_19(%arg0: i32) -> (i32, i32) {
    %c0_i32 = arith.constant 0 : i32
    %c0_i32_0 = arith.constant 0 : i32
    %c0_i32_1 = arith.constant 0 : i32
    return %c0_i32, %c0_i32_0 : i32, i32
  }
  func.func @transform_20(%arg0: i32) -> (i32, i32) {
    %c0_i32 = arith.constant 0 : i32
    %c0_i32_0 = arith.constant 0 : i32
    %c0_i32_1 = arith.constant 0 : i32
    return %c0_i32, %c0_i32_0 : i32, i32
  }
  func.func @transform_21(%arg0: i32) -> (i32, i32) {
    %c0_i32 = arith.constant 0 : i32
    %c0_i32_0 = arith.constant 0 : i32
    return %arg0, %c0_i32 : i32, i32
  }
}

</mosaic_0001>

<bundles_post_ra>
// kernel: tpu_custom_call.1
= control target key start
LH: loop header
LB: loop body
LE: loop exit
PB: predicated region body
PF: predicated region fallthrough
CT: control target
= control target key end

     0   :  { %s6115_s0 = inlined_call_operand.hbm [shape: f32[8,1024], index: 0, kind: input, shape index: {}]   ;;  %s6116_s1 = inlined_call_operand.hbm [shape: f32[8,300], index: 1, kind: input, shape index: {}]   ;;  %s6117_s2 = inlined_call_operand.hbm [shape: bf16[1024,512], index: 2, kind: input, shape index: {}]   ;;  %s6118_s3 = inlined_call_operand.vmem [shape: f32[1,512], index: 3, kind: input, shape index: {}]   ;;  %s6119_s4 = inlined_call_operand.hbm [shape: bf16[512,256], index: 4, kind: input, shape index: {}]   ;;  %s6120_s5 = inlined_call_operand.vmem [shape: f32[1,256], index: 5, kind: input, shape index: {}]   ;;  %s6121_s6 = inlined_call_operand.hbm [shape: bf16[300,256], index: 6, kind: input, shape index: {}]   ;;  %s6122_s7 = inlined_call_operand.vmem [shape: f32[1,256], index: 7, kind: input, shape index: {}]   ;;  %s6123_s8 = inlined_call_operand.hbm [shape: bf16[256,256], index: 8, kind: input, shape index: {}]   ;;  %s6124_s9 = inlined_call_operand.vmem [shape: f32[1,256], index: 9, kind: input, shape index: {}]   ;;  %s6125_s10 = inlined_call_operand.hbm [shape: bf16[256,128], index: 10, kind: input, shape index: {}]   ;;  %s6126_s11 = inlined_call_operand.hbm [shape: bf16[256,128], index: 11, kind: input, shape index: {}]   ;;  %s6127_s12 = inlined_call_operand.vmem [shape: f32[1,128], index: 12, kind: input, shape index: {}]   ;;  %s6128_s13 = inlined_call_operand.hbm [shape: bf16[128,128], index: 13, kind: input, shape index: {}]   ;;  %s6129_s14 = inlined_call_operand.vmem [shape: f32[1,128], index: 14, kind: input, shape index: {}]   ;;  %s6130_s15 = inlined_call_operand.hbm [shape: bf16[128,128], index: 15, kind: input, shape index: {}]   ;;  %s6131_s16 = inlined_call_operand.vmem [shape: f32[1,128], index: 16, kind: input, shape index: {}]   ;;  %s6132_s17 = inlined_call_operand.hbm [shape: bf16[256,128], index: 17, kind: input, shape index: {}]   ;;  %s6133_s18 = inlined_call_operand.vmem [shape: f32[1,128], index: 18, kind: input, shape index: {}]   ;;  %s6134_s19 = inlined_call_operand.hbm [shape: bf16[256,128], index: 19, kind: input, shape index: {}]   ;;  %s6135_s20 = inlined_call_operand.vmem [shape: f32[1,128], index: 20, kind: input, shape index: {}]   ;;  %s6136_s21 = inlined_call_operand.hbm [shape: f32[8,384], index: 21, kind: output, shape index: {}]  }
   0x1   :  { %6137 = sst [smem:[#allocation31_spill]] %s6115_s0 }
   0x2   :  { %6138 = sst [smem:[#allocation32_spill]] %s6116_s1 }
   0x3   :  { %6139 = sst [smem:[#allocation33_spill]] %s6117_s2 }
   0x4   :  { %6140 = sst [smem:[#allocation34_spill]] %s6118_s3 }
   0x5   :  { %6141 = sst [smem:[#allocation35_spill]] %s6119_s4 }
   0x6   :  { %6142 = sst [smem:[#allocation36_spill]] %s6120_s5 }
   0x7   :  { %26 = vsyncpa [#allocation3], 0 }
   0x8   :  { %27 = vsyncpa [#allocation6], 0 }
   0x9   :  { %28 = vsyncpa [#allocation9], 0 }
   0xa   :  { %29 = vsyncpa [#allocation12], 0 }
   0xb   :  { %30 = vsyncpa [#allocation15], 0 }
   0xc   :  { %31 = vsyncpa [#allocation18], 0 }
   0xd   :  { %32 = vsyncpa [#allocation21], 0 }
   0xe   :  { %33 = vsyncpa [#allocation4], 0  ;;  %s5783_s2 = smov [#allocation5]   ;;  %s5784_s26 = smov [#allocation8]  }
   0xf   :  { %s50_s25 = sshll.u32 %s5783_s2, 4  ;;  %s73_s27 = sshll.u32 %s5784_s26, 4  ;;  %s51_s25 = int_to_ptr.vmem [resolvable:$true] %s50_s25  ;;  %s74_s27 = int_to_ptr.vmem [resolvable:$true] %s73_s27 }
  0x10   :  { %s5515_s3 = scalar_lea.vmem %s51_s25, 384  ;;  %p5520_p1 = scmp.lt.s32.totalorder %s51_s25, %s51_s25 }
  0x11   :  { %p5516_p0 = scmp.ne.s32.totalorder %s51_s25, %s5515_s3  ;;  %p5521_p2 = scmp.lt.s32.totalorder %s5515_s3, %s5515_s3 }
  0x13   :  { %p5522_p3 = por %p5521_p2, %p5520_p1 }
  0x15   :  { %p5523_p4 = pnand %p5522_p3, %p5516_p0 }
  0x17   :  { %5526 = shalt.err (!%p5523_p4)
}
  0x18   :  { %s6143_s0 = sld [smem:[#allocation32_spill]]  ;;  %s5535_s4 = scalar_lea.vmem %s74_s27, 8192 }
  0x19   :  { %p5536_p5 = scmp.ne.s32.totalorder %s74_s27, %s5535_s4  ;;  %p5540_p6 = scmp.lt.s32.totalorder %s74_s27, %s74_s27 }
  0x1a   :  { %p5541_p7 = scmp.lt.s32.totalorder %s5535_s4, %s5535_s4 }
  0x1c   :  { %p5542_p8 = por %p5541_p7, %p5540_p6 }
  0x1e   :  { %53 = dma.hbm_to_vmem [thread:$0]  %s6143_s0, 384, %s51_s25, [#allocation6]  }
  0x1f   :  { %p5543_p9 = pnand %p5542_p8, %p5536_p5 }
  0x21   :  { %5546 = shalt.err (!%p5543_p9)
}
  0x22   :  { %s5785_s30 = smov 128   ;;  %s5786_s5 = smov 8  }
  0x23   :  { %s6144_s1 = sld [smem:[#allocation35_spill]]  ;;  %s5787_s24 = smov [#allocation11]  }
  0x24   :  { %s101_s2 = sshll.u32 %s5787_s24, 4  ;;  %s102_s2 = int_to_ptr.vmem [resolvable:$true] %s101_s2 }
  0x25   :  { %s5555_s25 = scalar_lea.vmem %s102_s2, 4096  ;;  %p5560_p11 = scmp.lt.s32.totalorder %s102_s2, %s102_s2 }
  0x26   :  { %p5556_p10 = scmp.ne.s32.totalorder %s102_s2, %s5555_s25  ;;  %p5561_p12 = scmp.lt.s32.totalorder %s5555_s25, %s5555_s25 }
  0x28   :  { %p5562_p13 = por %p5561_p12, %p5560_p11 }
  0x29   :  { %79 = dma.hbm_to_vmem [thread:$0]  %s6144_s1, 8192, %s74_s27, [#allocation9], %s5785_s30, %s5785_s30, %s5786_s5  }
  0x2a   :  { %p5563_p0 = pnand %p5562_p13, %p5556_p10 }
  0x2c   :  { %5566 = shalt.err (!%p5563_p0)
}
  0x2d   :  { %107 = dma.hbm_to_vmem [thread:$0]  %s6123_s8, 4096, %s102_s2, [#allocation12], %s5785_s30, %s5785_s30, %s5786_s5  }
  0x2e   :  { %s5788_s28 = smov [#allocation14]   ;;  %s5789_s27 = smov [#allocation17]  }
  0x2f   :  { %s127_s29 = sshll.u32 %s5788_s28, 4  ;;  %s155_s0 = sshll.u32 %s5789_s27, 4  ;;  %s128_s29 = int_to_ptr.vmem [resolvable:$true] %s127_s29  ;;  %s156_s0 = int_to_ptr.vmem [resolvable:$true] %s155_s0 }
  0x30   :  { %s5575_s4 = scalar_lea.vmem %s128_s29, 2048  ;;  %p5580_p2 = scmp.lt.s32.totalorder %s128_s29, %s128_s29 }
  0x31   :  { %p5576_p1 = scmp.ne.s32.totalorder %s128_s29, %s5575_s4  ;;  %p5581_p3 = scmp.lt.s32.totalorder %s5575_s4, %s5575_s4 }
  0x33   :  { %p5582_p4 = por %p5581_p3, %p5580_p2 }
  0x35   :  { %p5583_p5 = pnand %p5582_p4, %p5576_p1 }
  0x37   :  { %5586 = shalt.err (!%p5583_p5)
}
  0x38   :  { %s5790_s22 = smov 64   ;;  %s5791_s23 = smov 4  }
  0x39   :  { %133 = dma.hbm_to_vmem [thread:$0]  %s6126_s11, 2048, %s128_s29, [#allocation15], %s5790_s22, %s5790_s22, %s5791_s23  }
  0x3a   :  { %s5595_s8 = scalar_lea.vmem %s156_s0, 1024  ;;  %p5600_p7 = scmp.lt.s32.totalorder %s156_s0, %s156_s0 }
  0x3b   :  { %p5596_p6 = scmp.ne.s32.totalorder %s156_s0, %s5595_s8  ;;  %p5601_p8 = scmp.lt.s32.totalorder %s5595_s8, %s5595_s8 }
  0x3d   :  { %p5602_p9 = por %p5601_p8, %p5600_p7 }
  0x3f   :  { %p5603_p10 = pnand %p5602_p9, %p5596_p6 }
  0x41   :  { %5606 = shalt.err (!%p5603_p10)
}
  0x42   :  { %161 = dma.hbm_to_vmem [thread:$0]  %s6130_s15, 1024, %s156_s0, [#allocation18], %s5790_s22, %s5790_s22, %s5791_s23  }
  0x43   :  { %s5792_s26 = smov [#allocation2]   ;;  %s5793_s28 = smov [#allocation7]  }
  0x44   :  { %s40_s3 = sshll.u32 %s5792_s26, 4  ;;  %s59_s11 = sshll.u32 %s5793_s28, 4  ;;  %s41_s3 = int_to_ptr.vmem [resolvable:$true] %s40_s3  ;;  %s60_s11 = int_to_ptr.vmem [resolvable:$true] %s59_s11 }
  0x45   :  { %s5615_s29 = scalar_lea.vmem %s41_s3, 1024  ;;  %p5620_p12 = scmp.lt.s32.totalorder %s41_s3, %s41_s3 }
  0x46   :  { %p5616_p11 = scmp.ne.s32.totalorder %s41_s3, %s5615_s29  ;;  %p5621_p13 = scmp.lt.s32.totalorder %s5615_s29, %s5615_s29 }
  0x48   :  { %p5622_p0 = por %p5621_p13, %p5620_p12 }
  0x4a   :  { %p5623_p1 = pnand %p5622_p0, %p5616_p11 }
  0x4c   :  { %5626 = shalt.err (!%p5623_p1)
}
  0x4d   :  { %s6145_s1 = sld [smem:[#allocation31_spill]]  ;;  %s5635_s24 = scalar_lea.vmem %s60_s11, 32768 }
  0x4e   :  { %p5636_p2 = scmp.ne.s32.totalorder %s60_s11, %s5635_s24  ;;  %p5640_p3 = scmp.lt.s32.totalorder %s60_s11, %s60_s11 }
  0x4f   :  { %p5641_p4 = scmp.lt.s32.totalorder %s5635_s24, %s5635_s24 }
  0x51   :  { %p5642_p5 = por %p5641_p4, %p5640_p3 }
  0x53   :  { %43 = dma.hbm_to_vmem [thread:$0]  %s6145_s1, 1024, %s41_s3, [#allocation3]  }
  0x54   :  { %p5643_p6 = pnand %p5642_p5, %p5636_p2 }
  0x56   :  { %5646 = shalt.err (!%p5643_p6)
}
  0x57   :  { %s5794_s15 = smov 256   ;;  %s5795_s0 = smov 16  }
  0x58   :  { %s6146_s25 = sld [smem:[#allocation33_spill]]  ;;  %s5796_s26 = smov [#allocation10]  }
  0x59   :  { %s87_s28 = sshll.u32 %s5796_s26, 4  ;;  %s5797_s29 = smov [#allocation13]   ;;  %s88_s28 = int_to_ptr.vmem [resolvable:$true] %s87_s28 }
  0x5a   :  { %s115_s27 = sshll.u32 %s5797_s29, 4  ;;  %s5655_s3 = scalar_lea.vmem %s88_s28, 4864  ;;  %s116_s27 = int_to_ptr.vmem [resolvable:$true] %s115_s27 }
  0x5b   :  { %p5656_p7 = scmp.ne.s32.totalorder %s88_s28, %s5655_s3  ;;  %p5660_p8 = scmp.lt.s32.totalorder %s88_s28, %s88_s28 }
  0x5c   :  { %p5661_p9 = scmp.lt.s32.totalorder %s5655_s3, %s5655_s3 }
  0x5e   :  { %65 = dma.hbm_to_vmem [thread:$0]  %s6146_s25, 32768, %s60_s11, [#allocation6], %s5794_s15, %s5794_s15, %s5795_s0  }
  0x5f   :  { %p5662_p10 = por %p5661_p9, %p5660_p8 }
  0x61   :  { %p5663_p11 = pnand %p5662_p10, %p5656_p7 }
  0x63   :  { %5666 = shalt.err (!%p5663_p11)
}
  0x64   :  { %93 = dma.hbm_to_vmem [thread:$0]  %s6121_s6, 4864, %s88_s28, [#allocation9], %s5785_s30, %s5785_s30, %s5786_s5  }
  0x65   :  { %s5675_s11 = scalar_lea.vmem %s116_s27, 2048  ;;  %p5680_p13 = scmp.lt.s32.totalorder %s116_s27, %s116_s27 }
  0x66   :  { %p5676_p12 = scmp.ne.s32.totalorder %s116_s27, %s5675_s11  ;;  %p5681_p0 = scmp.lt.s32.totalorder %s5675_s11, %s5675_s11 }
  0x68   :  { %p5682_p1 = por %p5681_p0, %p5680_p13 }
  0x6a   :  { %p5683_p2 = pnand %p5682_p1, %p5676_p12 }
  0x6c   :  { %5686 = shalt.err (!%p5683_p2)
}
  0x6d   :  { %121 = dma.hbm_to_vmem [thread:$0]  %s6125_s10, 2048, %s116_s27, [#allocation12], %s5790_s22, %s5790_s22, %s5791_s23  }
  0x6e   :  { %s5798_s0 = smov [#allocation16]   ;;  %s5799_s2 = smov [#allocation19]  }
  0x6f   :  { %s141_s8 = sshll.u32 %s5798_s0, 4  ;;  %s169_s6 = sshll.u32 %s5799_s2, 4  ;;  %s142_s8 = int_to_ptr.vmem [resolvable:$true] %s141_s8  ;;  %s170_s6 = int_to_ptr.vmem [resolvable:$true] %s169_s6 }
  0x70   :  { %s5695_s30 = scalar_lea.vmem %s142_s8, 1024  ;;  %p5700_p4 = scmp.lt.s32.totalorder %s142_s8, %s142_s8 }
  0x71   :  { %p5696_p3 = scmp.ne.s32.totalorder %s142_s8, %s5695_s30  ;;  %p5701_p5 = scmp.lt.s32.totalorder %s5695_s30, %s5695_s30 }
  0x73   :  { %p5702_p6 = por %p5701_p5, %p5700_p4 }
  0x75   :  { %p5703_p7 = pnand %p5702_p6, %p5696_p3 }
  0x77   :  { %5706 = shalt.err (!%p5703_p7)
}
  0x78   :  { %147 = dma.hbm_to_vmem [thread:$0]  %s6128_s13, 1024, %s142_s8, [#allocation15], %s5790_s22, %s5790_s22, %s5791_s23  }
  0x79   :  { %s5715_s10 = scalar_lea.vmem %s170_s6, 2048  ;;  %p5720_p9 = scmp.lt.s32.totalorder %s170_s6, %s170_s6 }
  0x7a   :  { %p5716_p8 = scmp.ne.s32.totalorder %s170_s6, %s5715_s10  ;;  %p5721_p10 = scmp.lt.s32.totalorder %s5715_s10, %s5715_s10 }
  0x7c   :  { %p5722_p11 = por %p5721_p10, %p5720_p9 }
  0x7e   :  { %p5723_p12 = pnand %p5722_p11, %p5716_p8 }
  0x80   :  { %5726 = shalt.err (!%p5723_p12)
}
  0x81   :  { %175 = dma.hbm_to_vmem [thread:$0]  %s6132_s17, 2048, %s170_s6, [#allocation18], %s5790_s22, %s5790_s22, %s5791_s23  }
  0x82   :  { %s5800_s29 = smov [#allocation20]  }
  0x83   :  { %s183_s27 = sshll.u32 %s5800_s29, 4  ;;  %s184_s27 = int_to_ptr.vmem [resolvable:$true] %s183_s27 }
  0x84   :  { %s5735_s3 = scalar_lea.vmem %s184_s27, 2048  ;;  %p5740_p0 = scmp.lt.s32.totalorder %s184_s27, %s184_s27 }
  0x85   :  { %p5736_p13 = scmp.ne.s32.totalorder %s184_s27, %s5735_s3  ;;  %p5741_p1 = scmp.lt.s32.totalorder %s5735_s3, %s5735_s3 }
  0x87   :  { %p5742_p2 = por %p5741_p1, %p5740_p0 }
  0x89   :  { %p5743_p3 = pnand %p5742_p2, %p5736_p13 }
  0x8b   :  { %5746 = shalt.err (!%p5743_p3)
}
  0x8c   :  { %189 = dma.hbm_to_vmem [thread:$0]  %s6134_s19, 2048, %s184_s27, [#allocation21], %s5790_s22, %s5790_s22, %s5791_s23  }
  0x8d   :  { %5767 = dma.done.wait [#allocation3], 1024  }
  0x8e   :  { %5768 = vsyncadd [#allocation3], 4294966272 }
  0x8f   :  { %5769 = dma.done.wait [#allocation6], 33152  }
  0x90   :  { %5770 = vsyncadd [#allocation6], 4294934144 }
  0x91   :  { %5771 = dma.done.wait [#allocation9], 13056  }
  0x92   :  { %5772 = vsyncadd [#allocation9], 4294954240 }
  0x93   :  { %5773 = dma.done.wait [#allocation12], 6144  }
  0x94   :  { %5774 = vsyncadd [#allocation12], 4294961152 }
  0x95   :  { %5775 = dma.done.wait [#allocation15], 3072  }
  0x96   :  { %5776 = vsyncadd [#allocation15], 4294964224 }
  0x97   :  { %5777 = dma.done.wait [#allocation18], 3072  }
  0x98   :  { %5778 = vsyncadd [#allocation18], 4294964224 }
  0x99   :  { %5779 = dma.done.wait [#allocation21], 2048  }
  0x9a   :  { %5780 = vsyncadd [#allocation21], 4294965248  ;;  %v4830_v0 = vld [vmem:[#allocation7 + $0xe4] ss:$16 sps:$4 sm:$0xff]   ;;  %v4834_v2 = vld [vmem:[#allocation7 + $0xe0] ss:$16 sps:$4 sm:$0xff]  }
  0x9b   :  { %v4832_v1 = vld [vmem:[#allocation7 + $0x2e4] ss:$16 sps:$4 sm:$0xff]   ;;  %1803 = vmatprep.subr.bf16.mxu0 %v4830_v0  ;;  %v4835_v3 = vld [vmem:[#allocation7 + $0x2e0] ss:$16 sps:$4 sm:$0xff]   ;;  %s6147_s22 = sld [smem:[#allocation34_spill]]  ;;  %vm2867_vm0 = vcmask 1045504  }
  0x9c   :  { %1844 = vmatprep.subr.bf16.mxu1 %v4832_v1  ;;  %v4836_v4 = vld [vmem:[#allocation7 + $0xc4] ss:$16 sps:$4 sm:$0xff]   ;;  %1804 = vmatpush1.bf16.msra.mxu0 %v4834_v2  ;;  %v4840_v6 = vld [vmem:[#allocation7 + $0xc0] ss:$16 sps:$4 sm:$0xff]   ;;  %vm2863_vm1 = vcmask 359424   ;;  %s6148_s15 = sld [smem:[#allocation36_spill]] }
  0x9d   :  { %1845 = vmatpush1.bf16.msra.mxu1 %v4835_v3  ;;  %v4838_v5 = vld [vmem:[#allocation7 + $0x2c4] ss:$16 sps:$4 sm:$0xff]   ;;  %1805 = vmatprep.subr.bf16.mxu0 %v4836_v4  ;;  %v4841_v7 = vld [vmem:[#allocation7 + $0x2c0] ss:$16 sps:$4 sm:$0xff]   ;;  %v229_v4 = vld [vmem:[#allocation2] sm:$0xff]  ;;  %vm5803_vm2 = vmmov 0  }
  0x9e   :  { %1846 = vmatprep.subr.bf16.mxu1 %v4838_v5  ;;  %v4842_v8 = vld [vmem:[#allocation7 + $0xa4] ss:$16 sps:$4 sm:$0xff]   ;;  %v4846_v10 = vld [vmem:[#allocation7 + $0xa0] ss:$16 sps:$4 sm:$0xff]   ;;  %v231_v5 = vld [vmem:[#allocation2 + $0x10] sm:$0xff] }
  0x9f   :  { %v4844_v9 = vld [vmem:[#allocation7 + $0x2a4] ss:$16 sps:$4 sm:$0xff]   ;;  %v4847_v11 = vld [vmem:[#allocation7 + $0x2a0] ss:$16 sps:$4 sm:$0xff]  }
  0xa0   :  { %1806 = vmatpush1.bf16.msra.mxu0 %v4840_v6  ;;  %v4848_v12 = vld [vmem:[#allocation7 + $0x84] ss:$16 sps:$4 sm:$0xff]   ;;  %v4852_v14 = vld [vmem:[#allocation7 + $0x80] ss:$16 sps:$4 sm:$0xff]  }
  0xa1   :  { %1847 = vmatpush1.bf16.msra.mxu1 %v4841_v7  ;;  %1807 = vmatprep.subr.bf16.mxu0 %v4842_v8  ;;  %v4850_v13 = vld [vmem:[#allocation7 + $0x284] ss:$16 sps:$4 sm:$0xff]   ;;  %v4853_v15 = vld [vmem:[#allocation7 + $0x280] ss:$16 sps:$4 sm:$0xff]   ;;  %v5984_v8 = vpack.c.bf16 %v229_v4, %v229_v4 }
  0xa2   :  { %1848 = vmatprep.subr.bf16.mxu1 %v4844_v9  ;;  %v4854_v16 = vld [vmem:[#allocation7 + $0x64] ss:$16 sps:$4 sm:$0xff]   ;;  %v4858_v18 = vld [vmem:[#allocation7 + $0x60] ss:$16 sps:$4 sm:$0xff]   ;;  %v5986_v9 = vpack.c.bf16 %v231_v5, %v231_v5 }
  0xa3   :  { %v4856_v17 = vld [vmem:[#allocation7 + $0x264] ss:$16 sps:$4 sm:$0xff]   ;;  %v4859_v19 = vld [vmem:[#allocation7 + $0x260] ss:$16 sps:$4 sm:$0xff]  }
  0xa4   :  { %1808 = vmatpush1.bf16.msra.mxu0 %v4846_v10  ;;  %v4860_v20 = vld [vmem:[#allocation7 + $0x44] ss:$16 sps:$4 sm:$0xff]   ;;  %v4864_v22 = vld [vmem:[#allocation7 + $0x40] ss:$16 sps:$4 sm:$0xff]  }
  0xa5   :  { %1849 = vmatpush1.bf16.msra.mxu1 %v4847_v11  ;;  %1809 = vmatprep.subr.bf16.mxu0 %v4848_v12  ;;  %v4862_v21 = vld [vmem:[#allocation7 + $0x244] ss:$16 sps:$4 sm:$0xff]   ;;  %v4865_v23 = vld [vmem:[#allocation7 + $0x240] ss:$16 sps:$4 sm:$0xff]  }
  0xa6   :  { %1850 = vmatprep.subr.bf16.mxu1 %v4850_v13  ;;  %v4866_v24 = vld [vmem:[#allocation7 + $0x24] ss:$16 sps:$4 sm:$0xff]   ;;  %v4870_v26 = vld [vmem:[#allocation7 + $0x20] ss:$16 sps:$4 sm:$0xff]  }
  0xa7   :  { %v4868_v25 = vld [vmem:[#allocation7 + $0x224] ss:$16 sps:$4 sm:$0xff]   ;;  %v4871_v27 = vld [vmem:[#allocation7 + $0x220] ss:$16 sps:$4 sm:$0xff]  }
  0xa8   :  { %1810 = vmatpush1.bf16.msra.mxu0 %v4852_v14  ;;  %v4872_v28 = vld [vmem:[#allocation7 + $0x4] ss:$16 sps:$4 sm:$0xff]   ;;  %v4876_v30 = vld [vmem:[#allocation7] ss:$16 sps:$4 sm:$0xff]  }
  0xa9   :  { %1851 = vmatpush1.bf16.msra.mxu1 %v4853_v15  ;;  %1811 = vmatprep.subr.bf16.mxu0 %v4854_v16  ;;  %v4874_v29 = vld [vmem:[#allocation7 + $0x204] ss:$16 sps:$4 sm:$0xff]   ;;  %v4877_v31 = vld [vmem:[#allocation7 + $0x200] ss:$16 sps:$4 sm:$0xff]  }
  0xaa   :  { %1852 = vmatprep.subr.bf16.mxu1 %v4856_v17  ;;  %v4878_v32 = vld [vmem:[#allocation7 + $0x1e4] ss:$16 sps:$4 sm:$0xff]   ;;  %v4882_v34 = vld [vmem:[#allocation7 + $0x1e0] ss:$16 sps:$4 sm:$0xff]  }
  0xab   :  { %v4880_v33 = vld [vmem:[#allocation7 + $0x3e4] ss:$16 sps:$4 sm:$0xff]   ;;  %v4883_v35 = vld [vmem:[#allocation7 + $0x3e0] ss:$16 sps:$4 sm:$0xff]  }
  0xac   :  { %1812 = vmatpush1.bf16.msra.mxu0 %v4858_v18  ;;  %v4884_v36 = vld [vmem:[#allocation7 + $0x1c4] ss:$16 sps:$4 sm:$0xff]   ;;  %v4888_v38 = vld [vmem:[#allocation7 + $0x1c0] ss:$16 sps:$4 sm:$0xff]  }
  0xad   :  { %1853 = vmatpush1.bf16.msra.mxu1 %v4859_v19  ;;  %1813 = vmatprep.subr.bf16.mxu0 %v4860_v20  ;;  %v4886_v37 = vld [vmem:[#allocation7 + $0x3c4] ss:$16 sps:$4 sm:$0xff]   ;;  %v4889_v39 = vld [vmem:[#allocation7 + $0x3c0] ss:$16 sps:$4 sm:$0xff]  }
  0xae   :  { %1854 = vmatprep.subr.bf16.mxu1 %v4862_v21  ;;  %v4890_v40 = vld [vmem:[#allocation7 + $0x1a4] ss:$16 sps:$4 sm:$0xff]   ;;  %v4894_v42 = vld [vmem:[#allocation7 + $0x1a0] ss:$16 sps:$4 sm:$0xff]  }
  0xaf   :  { %v4892_v41 = vld [vmem:[#allocation7 + $0x3a4] ss:$16 sps:$4 sm:$0xff]   ;;  %v4895_v43 = vld [vmem:[#allocation7 + $0x3a0] ss:$16 sps:$4 sm:$0xff]  }
  0xb0   :  { %1814 = vmatpush1.bf16.msra.mxu0 %v4864_v22  ;;  %v4896_v44 = vld [vmem:[#allocation7 + $0x184] ss:$16 sps:$4 sm:$0xff]   ;;  %v4900_v47 = vld [vmem:[#allocation7 + $0x180] ss:$16 sps:$4 sm:$0xff]  }
  0xb1   :  { %1855 = vmatpush1.bf16.msra.mxu1 %v4865_v23  ;;  %1815 = vmatprep.subr.bf16.mxu0 %v4866_v24  ;;  %v4898_v45 = vld [vmem:[#allocation7 + $0x384] ss:$16 sps:$4 sm:$0xff]   ;;  %v4901_v48 = vld [vmem:[#allocation7 + $0x380] ss:$16 sps:$4 sm:$0xff]  }
  0xb2   :  { %1856 = vmatprep.subr.bf16.mxu1 %v4868_v25  ;;  %v230_v46 = vld [vmem:[#allocation2 + $0x8] sm:$0xff]  ;;  %v232_v50 = vld [vmem:[#allocation2 + $0x18] sm:$0xff] }
  0xb3   :  { %v5978_v49 = vpack.c.bf16 %v230_v46, %v230_v46  ;;  %v4902_v51 = vld [vmem:[#allocation7 + $0x164] ss:$16 sps:$4 sm:$0xff]   ;;  %v5980_v52 = vpack.c.bf16 %v232_v50, %v232_v50  ;;  %v4906_v54 = vld [vmem:[#allocation7 + $0x160] ss:$16 sps:$4 sm:$0xff]  }
  0xb4   :  { %1816 = vmatpush1.bf16.msra.mxu0 %v4870_v26  ;;  %v4904_v53 = vld [vmem:[#allocation7 + $0x364] ss:$16 sps:$4 sm:$0xff]   ;;  %v4907_v55 = vld [vmem:[#allocation7 + $0x360] ss:$16 sps:$4 sm:$0xff]  }
  0xb5   :  { %1857 = vmatpush1.bf16.msra.mxu1 %v4871_v27  ;;  %1817 = vmatprep.subr.bf16.mxu0 %v4872_v28  ;;  %v4908_v56 = vld [vmem:[#allocation7 + $0x144] ss:$16 sps:$4 sm:$0xff]   ;;  %v4912_v58 = vld [vmem:[#allocation7 + $0x140] ss:$16 sps:$4 sm:$0xff]  }
  0xb6   :  { %1858 = vmatprep.subr.bf16.mxu1 %v4874_v29  ;;  %1835 = vmatprep.mubr.bf16.mxu0 %v5978_v49  ;;  %v4910_v57 = vld [vmem:[#allocation7 + $0x344] ss:$16 sps:$4 sm:$0xff]   ;;  %v4913_v59 = vld [vmem:[#allocation7 + $0x340] ss:$16 sps:$4 sm:$0xff]  }
  0xb7   :  { %1876 = vmatprep.mubr.bf16.mxu1 %v5980_v52  ;;  %v4914_v60 = vld [vmem:[#allocation7 + $0x124] ss:$16 sps:$4 sm:$0xff]   ;;  %v4918_v62 = vld [vmem:[#allocation7 + $0x120] ss:$16 sps:$4 sm:$0xff]  }
  0xb8   :  { %1818 = vmatpush1.bf16.msra.mxu0 %v4876_v30  ;;  %v4916_v61 = vld [vmem:[#allocation7 + $0x324] ss:$16 sps:$4 sm:$0xff]   ;;  %v4919_v63 = vld [vmem:[#allocation7 + $0x320] ss:$16 sps:$4 sm:$0xff]  }
  0xb9   :  { %1859 = vmatpush1.bf16.msra.mxu1 %v4877_v31  ;;  %1819 = vmatprep.subr.bf16.mxu0 %v4878_v32  ;;  %v4920_v0 = vld [vmem:[#allocation7 + $0x104] ss:$16 sps:$4 sm:$0xff]   ;;  %v4924_v2 = vld [vmem:[#allocation7 + $0x100] ss:$16 sps:$4 sm:$0xff]  }
  0xba   :  { %1860 = vmatprep.subr.bf16.mxu1 %v4880_v33  ;;  %v4922_v1 = vld [vmem:[#allocation7 + $0x304] ss:$16 sps:$4 sm:$0xff]   ;;  %v4925_v3 = vld [vmem:[#allocation7 + $0x300] ss:$16 sps:$4 sm:$0xff]  }
  0xbb   :  { %v4928_v6 = vld [vmem:[#allocation7 + $0x4e4] ss:$16 sps:$4 sm:$0xff]   ;;  %v4926_v10 = vld [vmem:[#allocation7 + $0x4e0] ss:$16 sps:$4 sm:$0xff]  }
  0xbc   :  { %1820 = vmatpush2.bf16.msra.mxu0 %v4882_v34  ;;  %v4931_v7 = vld [vmem:[#allocation7 + $0x6e4] ss:$16 sps:$4 sm:$0xff]   ;;  %v4929_v11 = vld [vmem:[#allocation7 + $0x6e0] ss:$16 sps:$4 sm:$0xff]  }
  0xbd   :  { %1861 = vmatpush2.bf16.msra.mxu1 %v4883_v35  ;;  %1821 = vmatprep.subr.bf16.mxu0 %v4884_v36  ;;  %v4934_v12 = vld [vmem:[#allocation7 + $0x4c4] ss:$16 sps:$4 sm:$0xff]   ;;  %v4932_v14 = vld [vmem:[#allocation7 + $0x4c0] ss:$16 sps:$4 sm:$0xff]  }
  0xbe   :  { %1862 = vmatprep.subr.bf16.mxu1 %v4886_v37  ;;  %v4937_v13 = vld [vmem:[#allocation7 + $0x6c4] ss:$16 sps:$4 sm:$0xff]   ;;  %v4935_v15 = vld [vmem:[#allocation7 + $0x6c0] ss:$16 sps:$4 sm:$0xff]  }
  0xbf   :  { %v4940_v16 = vld [vmem:[#allocation7 + $0x4a4] ss:$16 sps:$4 sm:$0xff]   ;;  %v4938_v18 = vld [vmem:[#allocation7 + $0x4a0] ss:$16 sps:$4 sm:$0xff]  }
  0xc0   :  { %1822 = vmatpush2.bf16.msra.mxu0 %v4888_v38  ;;  %v4943_v17 = vld [vmem:[#allocation7 + $0x6a4] ss:$16 sps:$4 sm:$0xff]   ;;  %v4941_v19 = vld [vmem:[#allocation7 + $0x6a0] ss:$16 sps:$4 sm:$0xff]  }
  0xc1   :  { %1863 = vmatpush2.bf16.msra.mxu1 %v4889_v39  ;;  %1823 = vmatprep.subr.bf16.mxu0 %v4890_v40  ;;  %v4946_v20 = vld [vmem:[#allocation7 + $0x484] ss:$16 sps:$4 sm:$0xff]   ;;  %v4944_v22 = vld [vmem:[#allocation7 + $0x480] ss:$16 sps:$4 sm:$0xff]  }
  0xc2   :  { %1864 = vmatprep.subr.bf16.mxu1 %v4892_v41  ;;  %v4949_v21 = vld [vmem:[#allocation7 + $0x684] ss:$16 sps:$4 sm:$0xff]   ;;  %v4947_v23 = vld [vmem:[#allocation7 + $0x680] ss:$16 sps:$4 sm:$0xff]  }
  0xc3   :  { %v4952_v24 = vld [vmem:[#allocation7 + $0x464] ss:$16 sps:$4 sm:$0xff]   ;;  %v4950_v26 = vld [vmem:[#allocation7 + $0x460] ss:$16 sps:$4 sm:$0xff]  }
  0xc4   :  { %1824 = vmatpush2.bf16.msra.mxu0 %v4894_v42  ;;  %v4955_v25 = vld [vmem:[#allocation7 + $0x664] ss:$16 sps:$4 sm:$0xff]   ;;  %v4953_v27 = vld [vmem:[#allocation7 + $0x660] ss:$16 sps:$4 sm:$0xff]  }
  0xc5   :  { %1865 = vmatpush2.bf16.msra.mxu1 %v4895_v43  ;;  %1825 = vmatprep.subr.bf16.mxu0 %v4896_v44  ;;  %v4958_v28 = vld [vmem:[#allocation7 + $0x444] ss:$16 sps:$4 sm:$0xff]   ;;  %v4956_v30 = vld [vmem:[#allocation7 + $0x440] ss:$16 sps:$4 sm:$0xff]  }
  0xc6   :  { %1866 = vmatprep.subr.bf16.mxu1 %v4898_v45  ;;  %v4961_v29 = vld [vmem:[#allocation7 + $0x644] ss:$16 sps:$4 sm:$0xff]   ;;  %v4959_v31 = vld [vmem:[#allocation7 + $0x640] ss:$16 sps:$4 sm:$0xff]  }
  0xc7   :  { %v4964_v32 = vld [vmem:[#allocation7 + $0x424] ss:$16 sps:$4 sm:$0xff]   ;;  %v4962_v35 = vld [vmem:[#allocation7 + $0x420] ss:$16 sps:$4 sm:$0xff]  }
  0xc8   :  { %1826 = vmatpush2.bf16.msra.mxu0 %v4900_v47  ;;  %v4967_v33 = vld [vmem:[#allocation7 + $0x624] ss:$16 sps:$4 sm:$0xff]   ;;  %v4965_v36 = vld [vmem:[#allocation7 + $0x620] ss:$16 sps:$4 sm:$0xff]  }
  0xc9   :  { %1867 = vmatpush2.bf16.msra.mxu1 %v4901_v48  ;;  %1827 = vmatprep.subr.bf16.mxu0 %v4902_v51  ;;  %v234_v34 = vld [vmem:[#allocation2 + $0x28] sm:$0xff]  ;;  %v236_v38 = vld [vmem:[#allocation2 + $0x38] sm:$0xff] }
  0xca   :  { %1868 = vmatprep.subr.bf16.mxu1 %v4904_v53  ;;  %v5990_v37 = vpack.c.bf16 %v234_v34, %v234_v34  ;;  %v4970_v39 = vld [vmem:[#allocation7 + $0x404] ss:$16 sps:$4 sm:$0xff]   ;;  %v5992_v40 = vpack.c.bf16 %v236_v38, %v236_v38  ;;  %v4968_v42 = vld [vmem:[#allocation7 + $0x400] ss:$16 sps:$4 sm:$0xff]   ;;  %v5040_v34 = vld [vmem:[#allocation7 + $0x88] ss:$16 sps:$4 sm:$0xff]  }
  0xcb   :  { %v4973_v41 = vld [vmem:[#allocation7 + $0x604] ss:$16 sps:$4 sm:$0xff]   ;;  %v4971_v43 = vld [vmem:[#allocation7 + $0x600] ss:$16 sps:$4 sm:$0xff]   ;;  %v5051_v38 = vld [vmem:[#allocation7 + $0x26c] ss:$16 sps:$4 sm:$0xff]  }
  0xcc   :  { %1828 = vmatpush2.bf16.msra.mxu0 %v4906_v54  ;;  %v4976_v44 = vld [vmem:[#allocation7 + $0x5e4] ss:$16 sps:$4 sm:$0xff]   ;;  %v4974_v46 = vld [vmem:[#allocation7 + $0x5e0] ss:$16 sps:$4 sm:$0xff]  }
  0xcd   :  { %1869 = vmatpush2.bf16.msra.mxu1 %v4907_v55  ;;  %1829 = vmatprep.subr.bf16.mxu0 %v4908_v56  ;;  %v4979_v45 = vld [vmem:[#allocation7 + $0x7e4] ss:$16 sps:$4 sm:$0xff]   ;;  %v4977_v47 = vld [vmem:[#allocation7 + $0x7e0] ss:$16 sps:$4 sm:$0xff]  }
  0xce   :  { %1870 = vmatprep.subr.bf16.mxu1 %v4910_v57  ;;  %v4982_v48 = vld [vmem:[#allocation7 + $0x5c4] ss:$16 sps:$4 sm:$0xff]   ;;  %v4980_v51 = vld [vmem:[#allocation7 + $0x5c0] ss:$16 sps:$4 sm:$0xff]  }
  0xcf   :  { %v4985_v50 = vld [vmem:[#allocation7 + $0x7c4] ss:$16 sps:$4 sm:$0xff]   ;;  %v4983_v53 = vld [vmem:[#allocation7 + $0x7c0] ss:$16 sps:$4 sm:$0xff]  }
  0xd0   :  { %1830 = vmatpush2.bf16.msra.mxu0 %v4912_v58  ;;  %v4988_v54 = vld [vmem:[#allocation7 + $0x5a4] ss:$16 sps:$4 sm:$0xff]   ;;  %v4986_v56 = vld [vmem:[#allocation7 + $0x5a0] ss:$16 sps:$4 sm:$0xff]  }
  0xd1   :  { %1871 = vmatpush2.bf16.msra.mxu1 %v4913_v59  ;;  %1831 = vmatprep.subr.bf16.mxu0 %v4914_v60  ;;  %v4991_v55 = vld [vmem:[#allocation7 + $0x7a4] ss:$16 sps:$4 sm:$0xff]   ;;  %v4989_v57 = vld [vmem:[#allocation7 + $0x7a0] ss:$16 sps:$4 sm:$0xff]  }
  0xd2   :  { %1872 = vmatprep.subr.bf16.mxu1 %v4916_v61  ;;  %v4994_v58 = vld [vmem:[#allocation7 + $0x584] ss:$16 sps:$4 sm:$0xff]   ;;  %v4992_v60 = vld [vmem:[#allocation7 + $0x580] ss:$16 sps:$4 sm:$0xff]  }
  0xd3   :  { %v4997_v59 = vld [vmem:[#allocation7 + $0x784] ss:$16 sps:$4 sm:$0xff]   ;;  %v4995_v61 = vld [vmem:[#allocation7 + $0x780] ss:$16 sps:$4 sm:$0xff]  }
  0xd4   :  { %1832 = vmatpush2.bf16.msra.mxu0 %v4918_v62  ;;  %v5000_v62 = vld [vmem:[#allocation7 + $0x564] ss:$16 sps:$4 sm:$0xff]   ;;  %v5004_v4 = vld [vmem:[#allocation7 + $0x540] ss:$16 sps:$4 sm:$0xff]  }
  0xd5   :  { %1873 = vmatpush2.bf16.msra.mxu1 %v4919_v63  ;;  %1833 = vmatprep.subr.bf16.mxu0 %v4920_v0  ;;  %v5003_v63 = vld [vmem:[#allocation7 + $0x764] ss:$16 sps:$4 sm:$0xff]   ;;  %v4998_v0 = vld [vmem:[#allocation7 + $0x560] ss:$16 sps:$4 sm:$0xff]  }
  0xd6   :  { %1874 = vmatprep.subr.bf16.mxu1 %v4922_v1  ;;  %v5001_v1 = vld [vmem:[#allocation7 + $0x760] ss:$16 sps:$4 sm:$0xff]  }
  0xd7   :  { %v5007_v5 = vld [vmem:[#allocation7 + $0x740] ss:$16 sps:$4 sm:$0xff]  }
  0xd8   :  { %1834 = vmatpush2.bf16.msra.mxu0 %v4924_v2  ;;  %v5006_v2 = vld [vmem:[#allocation7 + $0x544] ss:$16 sps:$4 sm:$0xff]  }
  0xd9   :  { %1875 = vmatpush2.bf16.msra.mxu1 %v4925_v3  ;;  %1885 = vmatprep.subr.bf16.mxu0 %v4928_v6  ;;  %v5009_v3 = vld [vmem:[#allocation7 + $0x744] ss:$16 sps:$4 sm:$0xff]  }
  0xda   :  { %1926 = vmatprep.subr.bf16.mxu1 %v4931_v7  ;;  %v5012_v6 = vld [vmem:[#allocation7 + $0x524] ss:$16 sps:$4 sm:$0xff]  }
  0xdb   :  { %1836 = vmatmul.mubr.bf16.vlgmr.msra.gmra.mxu0 %v5984_v8  ;;  %v5015_v7 = vld [vmem:[#allocation7 + $0x724] ss:$16 sps:$4 sm:$0xff]  }
  0xdc   :  { %1877 = vmatmul.mubr.bf16.vlgmr.msra.gmra.mxu1 %v5986_v9  ;;  %1886 = vmatpush1.bf16.msra.mxu0 %v4926_v10  ;;  %v5010_v10 = vld [vmem:[#allocation7 + $0x520] ss:$16 sps:$4 sm:$0xff]  }
  0xdd   :  { %1927 = vmatpush1.bf16.msra.mxu1 %v4929_v11  ;;  %1887 = vmatprep.subr.bf16.mxu0 %v4934_v12  ;;  %v5013_v11 = vld [vmem:[#allocation7 + $0x720] ss:$16 sps:$4 sm:$0xff]   ;;  %v5018_v12 = vld [vmem:[#allocation7 + $0x504] ss:$16 sps:$4 sm:$0xff]  }
  0xde   :  { %1928 = vmatprep.subr.bf16.mxu1 %v4937_v13  ;;  %1917 = vmatprep.mubr.bf16.mxu0 %v5990_v37  ;;  %v5021_v13 = vld [vmem:[#allocation7 + $0x704] ss:$16 sps:$4 sm:$0xff]  }
  0xdf   :  { %1958 = vmatprep.mubr.bf16.mxu1 %v5992_v40 }
  0xe0   :  { %1888 = vmatpush1.bf16.msra.mxu0 %v4932_v14  ;;  %v5016_v14 = vld [vmem:[#allocation7 + $0x500] ss:$16 sps:$4 sm:$0xff]  }
  0xe1   :  { %1929 = vmatpush1.bf16.msra.mxu1 %v4935_v15  ;;  %1889 = vmatprep.subr.bf16.mxu0 %v4940_v16  ;;  %v5019_v15 = vld [vmem:[#allocation7 + $0x700] ss:$16 sps:$4 sm:$0xff]   ;;  %v233_v16 = vld [vmem:[#allocation2 + $0x20] sm:$0xff] }
  0xe2   :  { %1930 = vmatprep.subr.bf16.mxu1 %v4943_v17  ;;  %v235_v17 = vld [vmem:[#allocation2 + $0x30] sm:$0xff] }
  0xe4   :  { %1890 = vmatpush1.bf16.msra.mxu0 %v4938_v18  ;;  %v5024_v18 = vld [vmem:[#allocation7 + $0xec] ss:$16 sps:$4 sm:$0xff]  }
  0xe5   :  { %1931 = vmatpush1.bf16.msra.mxu1 %v4941_v19  ;;  %1891 = vmatprep.subr.bf16.mxu0 %v4946_v20  ;;  %v5027_v19 = vld [vmem:[#allocation7 + $0x2ec] ss:$16 sps:$4 sm:$0xff]   ;;  %v5996_v20 = vpack.c.bf16 %v233_v16, %v233_v16 }
  0xe6   :  { %1932 = vmatprep.subr.bf16.mxu1 %v4949_v21  ;;  %v5998_v21 = vpack.c.bf16 %v235_v17, %v235_v17  ;;  %v5108_v16 = vld [vmem:[#allocation7 + $0x12c] ss:$16 sps:$4 sm:$0xff]  }
  0xe7   :  { %v5111_v17 = vld [vmem:[#allocation7 + $0x32c] ss:$16 sps:$4 sm:$0xff]  }
  0xe8   :  { %1892 = vmatpush1.bf16.msra.mxu0 %v4944_v22  ;;  %v5022_v22 = vld [vmem:[#allocation7 + $0xe8] ss:$16 sps:$4 sm:$0xff]  }
  0xe9   :  { %1933 = vmatpush1.bf16.msra.mxu1 %v4947_v23  ;;  %1893 = vmatprep.subr.bf16.mxu0 %v4952_v24  ;;  %v5025_v23 = vld [vmem:[#allocation7 + $0x2e8] ss:$16 sps:$4 sm:$0xff]   ;;  %v5030_v24 = vld [vmem:[#allocation7 + $0xcc] ss:$16 sps:$4 sm:$0xff]  }
  0xea   :  { %1934 = vmatprep.subr.bf16.mxu1 %v4955_v25  ;;  %v5033_v25 = vld [vmem:[#allocation7 + $0x2cc] ss:$16 sps:$4 sm:$0xff]  }
  0xec   :  { %1894 = vmatpush1.bf16.msra.mxu0 %v4950_v26  ;;  %v5028_v26 = vld [vmem:[#allocation7 + $0xc8] ss:$16 sps:$4 sm:$0xff]  }
  0xed   :  { %1935 = vmatpush1.bf16.msra.mxu1 %v4953_v27  ;;  %1895 = vmatprep.subr.bf16.mxu0 %v4958_v28  ;;  %v5031_v27 = vld [vmem:[#allocation7 + $0x2c8] ss:$16 sps:$4 sm:$0xff]   ;;  %v5036_v28 = vld [vmem:[#allocation7 + $0xac] ss:$16 sps:$4 sm:$0xff]  }
  0xee   :  { %1936 = vmatprep.subr.bf16.mxu1 %v4961_v29  ;;  %v5039_v29 = vld [vmem:[#allocation7 + $0x2ac] ss:$16 sps:$4 sm:$0xff]  }
  0xf0   :  { %1896 = vmatpush1.bf16.msra.mxu0 %v4956_v30  ;;  %v5034_v30 = vld [vmem:[#allocation7 + $0xa8] ss:$16 sps:$4 sm:$0xff]  }
  0xf1   :  { %1937 = vmatpush1.bf16.msra.mxu1 %v4959_v31  ;;  %1897 = vmatprep.subr.bf16.mxu0 %v4964_v32  ;;  %v5037_v31 = vld [vmem:[#allocation7 + $0x2a8] ss:$16 sps:$4 sm:$0xff]   ;;  %v5042_v32 = vld [vmem:[#allocation7 + $0x8c] ss:$16 sps:$4 sm:$0xff]  }
  0xf2   :  { %1938 = vmatprep.subr.bf16.mxu1 %v4967_v33  ;;  %v5045_v33 = vld [vmem:[#allocation7 + $0x28c] ss:$16 sps:$4 sm:$0xff]  }
  0xf4   :  { %1898 = vmatpush1.bf16.msra.mxu0 %v4962_v35  ;;  %v5043_v35 = vld [vmem:[#allocation7 + $0x288] ss:$16 sps:$4 sm:$0xff]  }
  0xf5   :  { %1939 = vmatpush1.bf16.msra.mxu1 %v4965_v36  ;;  %1899 = vmatprep.subr.bf16.mxu0 %v4970_v39  ;;  %v5048_v36 = vld [vmem:[#allocation7 + $0x6c] ss:$16 sps:$4 sm:$0xff]   ;;  %v5046_v39 = vld [vmem:[#allocation7 + $0x68] ss:$16 sps:$4 sm:$0xff]  }
  0xf6   :  { %1940 = vmatprep.subr.bf16.mxu1 %v4973_v41  ;;  %v5057_v41 = vld [vmem:[#allocation7 + $0x24c] ss:$16 sps:$4 sm:$0xff]  }
  0xf8   :  { %1900 = vmatpush1.bf16.msra.mxu0 %v4968_v42  ;;  %v5052_v42 = vld [vmem:[#allocation7 + $0x48] ss:$16 sps:$4 sm:$0xff]  }
  0xf9   :  { %1941 = vmatpush1.bf16.msra.mxu1 %v4971_v43  ;;  %1901 = vmatprep.subr.bf16.mxu0 %v4976_v44  ;;  %v5055_v43 = vld [vmem:[#allocation7 + $0x248] ss:$16 sps:$4 sm:$0xff]   ;;  %v5060_v44 = vld [vmem:[#allocation7 + $0x2c] ss:$16 sps:$4 sm:$0xff]  }
  0xfa   :  { %1942 = vmatprep.subr.bf16.mxu1 %v4979_v45  ;;  %v5063_v45 = vld [vmem:[#allocation7 + $0x22c] ss:$16 sps:$4 sm:$0xff]  }
  0xfc   :  { %1902 = vmatpush2.bf16.msra.mxu0 %v4974_v46  ;;  %v5058_v46 = vld [vmem:[#allocation7 + $0x28] ss:$16 sps:$4 sm:$0xff]  }
  0xfd   :  { %1943 = vmatpush2.bf16.msra.mxu1 %v4977_v47  ;;  %1903 = vmatprep.subr.bf16.mxu0 %v4982_v48  ;;  %v5061_v47 = vld [vmem:[#allocation7 + $0x228] ss:$16 sps:$4 sm:$0xff]   ;;  %v5066_v48 = vld [vmem:[#allocation7 + $0xc] ss:$16 sps:$4 sm:$0xff]  }
  0xfe   :  { %1944 = vmatprep.subr.bf16.mxu1 %v4985_v50  ;;  %v5069_v50 = vld [vmem:[#allocation7 + $0x20c] ss:$16 sps:$4 sm:$0xff]  }
 0x100   :  { %1904 = vmatpush2.bf16.msra.mxu0 %v4980_v51  ;;  %v5064_v51 = vld [vmem:[#allocation7 + $0x8] ss:$16 sps:$4 sm:$0xff]  }
 0x101   :  { %1945 = vmatpush2.bf16.msra.mxu1 %v4983_v53  ;;  %1905 = vmatprep.subr.bf16.mxu0 %v4988_v54  ;;  %v5067_v53 = vld [vmem:[#allocation7 + $0x208] ss:$16 sps:$4 sm:$0xff]   ;;  %v5072_v54 = vld [vmem:[#allocation7 + $0x1ec] ss:$16 sps:$4 sm:$0xff]  }
 0x102   :  { %1946 = vmatprep.subr.bf16.mxu1 %v4991_v55  ;;  %v5075_v55 = vld [vmem:[#allocation7 + $0x3ec] ss:$16 sps:$4 sm:$0xff]  }
 0x104   :  { %1906 = vmatpush2.bf16.msra.mxu0 %v4986_v56  ;;  %v5070_v56 = vld [vmem:[#allocation7 + $0x1e8] ss:$16 sps:$4 sm:$0xff]  }
 0x105   :  { %1947 = vmatpush2.bf16.msra.mxu1 %v4989_v57  ;;  %1907 = vmatprep.subr.bf16.mxu0 %v4994_v58  ;;  %v5073_v57 = vld [vmem:[#allocation7 + $0x3e8] ss:$16 sps:$4 sm:$0xff]   ;;  %v5078_v58 = vld [vmem:[#allocation7 + $0x1cc] ss:$16 sps:$4 sm:$0xff]  }
 0x106   :  { %1948 = vmatprep.subr.bf16.mxu1 %v4997_v59  ;;  %v5081_v59 = vld [vmem:[#allocation7 + $0x3cc] ss:$16 sps:$4 sm:$0xff]  }
 0x108   :  { %1908 = vmatpush2.bf16.msra.mxu0 %v4992_v60  ;;  %v5076_v60 = vld [vmem:[#allocation7 + $0x1c8] ss:$16 sps:$4 sm:$0xff]  }
 0x109   :  { %1949 = vmatpush2.bf16.msra.mxu1 %v4995_v61  ;;  %1909 = vmatprep.subr.bf16.mxu0 %v5000_v62  ;;  %v5079_v61 = vld [vmem:[#allocation7 + $0x3c8] ss:$16 sps:$4 sm:$0xff]   ;;  %v5084_v62 = vld [vmem:[#allocation7 + $0x1ac] ss:$16 sps:$4 sm:$0xff]  }
 0x10a   :  { %1950 = vmatprep.subr.bf16.mxu1 %v5003_v63  ;;  %v5087_v63 = vld [vmem:[#allocation7 + $0x3ac] ss:$16 sps:$4 sm:$0xff]  }
 0x10c   :  { %1910 = vmatpush2.bf16.msra.mxu0 %v4998_v0  ;;  %v5082_v0 = vld [vmem:[#allocation7 + $0x1a8] ss:$16 sps:$4 sm:$0xff]  }
 0x10d   :  { %1951 = vmatpush2.bf16.msra.mxu1 %v5001_v1  ;;  %1911 = vmatprep.subr.bf16.mxu0 %v5006_v2  ;;  %v5085_v1 = vld [vmem:[#allocation7 + $0x3a8] ss:$16 sps:$4 sm:$0xff]   ;;  %v5090_v2 = vld [vmem:[#allocation7 + $0x18c] ss:$16 sps:$4 sm:$0xff]  }
 0x10e   :  { %1952 = vmatprep.subr.bf16.mxu1 %v5009_v3  ;;  %v5093_v3 = vld [vmem:[#allocation7 + $0x38c] ss:$16 sps:$4 sm:$0xff]  }
 0x110   :  { %1912 = vmatpush2.bf16.msra.mxu0 %v5004_v4  ;;  %v5088_v4 = vld [vmem:[#allocation7 + $0x188] ss:$16 sps:$4 sm:$0xff]  }
 0x111   :  { %1953 = vmatpush2.bf16.msra.mxu1 %v5007_v5  ;;  %1913 = vmatprep.subr.bf16.mxu0 %v5012_v6  ;;  %v5091_v5 = vld [vmem:[#allocation7 + $0x388] ss:$16 sps:$4 sm:$0xff]   ;;  %v5096_v6 = vld [vmem:[#allocation7 + $0x16c] ss:$16 sps:$4 sm:$0xff]  }
 0x112   :  { %1954 = vmatprep.subr.bf16.mxu1 %v5015_v7  ;;  %v5099_v7 = vld [vmem:[#allocation7 + $0x36c] ss:$16 sps:$4 sm:$0xff]  }
 0x114   :  { %1914 = vmatpush2.bf16.msra.mxu0 %v5010_v10  ;;  %v5094_v10 = vld [vmem:[#allocation7 + $0x168] ss:$16 sps:$4 sm:$0xff]  }
 0x115   :  { %1955 = vmatpush2.bf16.msra.mxu1 %v5013_v11  ;;  %1915 = vmatprep.subr.bf16.mxu0 %v5018_v12  ;;  %v5097_v11 = vld [vmem:[#allocation7 + $0x368] ss:$16 sps:$4 sm:$0xff]   ;;  %v5102_v12 = vld [vmem:[#allocation7 + $0x14c] ss:$16 sps:$4 sm:$0xff]  }
 0x116   :  { %1956 = vmatprep.subr.bf16.mxu1 %v5021_v13  ;;  %v5105_v13 = vld [vmem:[#allocation7 + $0x34c] ss:$16 sps:$4 sm:$0xff]  }
 0x118   :  { %1916 = vmatpush2.bf16.msra.mxu0 %v5016_v14  ;;  %v5100_v14 = vld [vmem:[#allocation7 + $0x148] ss:$16 sps:$4 sm:$0xff]  }
 0x119   :  { %1957 = vmatpush2.bf16.msra.mxu1 %v5019_v15  ;;  %1967 = vmatprep.subr.bf16.mxu0 %v5024_v18  ;;  %v5103_v15 = vld [vmem:[#allocation7 + $0x348] ss:$16 sps:$4 sm:$0xff]  }
 0x11a   :  { %2008 = vmatprep.subr.bf16.mxu1 %v5027_v19  ;;  %v5106_v18 = vld [vmem:[#allocation7 + $0x128] ss:$16 sps:$4 sm:$0xff]  }
 0x11b   :  { %1918 = vmatmul.mubr.bf16.vlgmr.msra.gmra.mxu0 %v5996_v20  ;;  %v5109_v19 = vld [vmem:[#allocation7 + $0x328] ss:$16 sps:$4 sm:$0xff]  }
 0x11c   :  { %1959 = vmatmul.mubr.bf16.vlgmr.msra.gmra.mxu1 %v5998_v21  ;;  %1968 = vmatpush1.bf16.msra.mxu0 %v5022_v22  ;;  %v5114_v22 = vld [vmem:[#allocation7 + $0x10c] ss:$16 sps:$4 sm:$0xff]  }
 0x11d   :  { %2009 = vmatpush1.bf16.msra.mxu1 %v5025_v23  ;;  %1969 = vmatprep.subr.bf16.mxu0 %v5030_v24  ;;  %v5117_v23 = vld [vmem:[#allocation7 + $0x30c] ss:$16 sps:$4 sm:$0xff]   ;;  %v5112_v24 = vld [vmem:[#allocation7 + $0x108] ss:$16 sps:$4 sm:$0xff]  }
 0x11e   :  { %2010 = vmatprep.subr.bf16.mxu1 %v5033_v25  ;;  %1999 = vmatprep.mubr.bf16.mxu0 %v5978_v49  ;;  %v5049_v49 = vld [vmem:[#allocation7 + $0x268] ss:$16 sps:$4 sm:$0xff]  }
 0x11f   :  { %2040 = vmatprep.mubr.bf16.mxu1 %v5980_v52  ;;  %v5054_v52 = vld [vmem:[#allocation7 + $0x4c] ss:$16 sps:$4 sm:$0xff]   ;;  %v5115_v25 = vld [vmem:[#allocation7 + $0x308] ss:$16 sps:$4 sm:$0xff]  }
 0x120   :  { %1970 = vmatpush1.bf16.msra.mxu0 %v5028_v26  ;;  %v5120_v26 = vld [vmem:[#allocation7 + $0x4ec] ss:$16 sps:$4 sm:$0xff]  }
 0x121   :  { %2011 = vmatpush1.bf16.msra.mxu1 %v5031_v27  ;;  %1971 = vmatprep.subr.bf16.mxu0 %v5036_v28  ;;  %v5123_v27 = vld [vmem:[#allocation7 + $0x6ec] ss:$16 sps:$4 sm:$0xff]   ;;  %v5118_v28 = vld [vmem:[#allocation7 + $0x4e8] ss:$16 sps:$4 sm:$0xff]  }
 0x122   :  { %2012 = vmatprep.subr.bf16.mxu1 %v5039_v29  ;;  %v5121_v29 = vld [vmem:[#allocation7 + $0x6e8] ss:$16 sps:$4 sm:$0xff]  }
 0x124   :  { %1972 = vmatpush1.bf16.msra.mxu0 %v5034_v30  ;;  %v5126_v30 = vld [vmem:[#allocation7 + $0x4cc] ss:$16 sps:$4 sm:$0xff]  }
 0x125   :  { %2013 = vmatpush1.bf16.msra.mxu1 %v5037_v31  ;;  %1973 = vmatprep.subr.bf16.mxu0 %v5042_v32  ;;  %v5129_v31 = vld [vmem:[#allocation7 + $0x6cc] ss:$16 sps:$4 sm:$0xff]   ;;  %v5124_v32 = vld [vmem:[#allocation7 + $0x4c8] ss:$16 sps:$4 sm:$0xff]  }
 0x126   :  { %2014 = vmatprep.subr.bf16.mxu1 %v5045_v33  ;;  %v5127_v33 = vld [vmem:[#allocation7 + $0x6c8] ss:$16 sps:$4 sm:$0xff]  }
 0x128   :  { %1974 = vmatpush1.bf16.msra.mxu0 %v5040_v34  ;;  %v5132_v34 = vld [vmem:[#allocation7 + $0x4ac] ss:$16 sps:$4 sm:$0xff]  }
 0x129   :  { %2015 = vmatpush1.bf16.msra.mxu1 %v5043_v35  ;;  %1975 = vmatprep.subr.bf16.mxu0 %v5048_v36  ;;  %v5135_v35 = vld [vmem:[#allocation7 + $0x6ac] ss:$16 sps:$4 sm:$0xff]   ;;  %v5130_v36 = vld [vmem:[#allocation7 + $0x4a8] ss:$16 sps:$4 sm:$0xff]  }
 0x12a   :  { %2016 = vmatprep.subr.bf16.mxu1 %v5051_v38  ;;  %v5133_v38 = vld [vmem:[#allocation7 + $0x6a8] ss:$16 sps:$4 sm:$0xff]  }
 0x12c   :  { %1976 = vmatpush1.bf16.msra.mxu0 %v5046_v39  ;;  %v5138_v39 = vld [vmem:[#allocation7 + $0x48c] ss:$16 sps:$4 sm:$0xff]  }
 0x12d   :  { %2017 = vmatpush1.bf16.msra.mxu1 %v5049_v49  ;;  %1977 = vmatprep.subr.bf16.mxu0 %v5054_v52  ;;  %v5136_v49 = vld [vmem:[#allocation7 + $0x488] ss:$16 sps:$4 sm:$0xff]   ;;  %v5144_v52 = vld [vmem:[#allocation7 + $0x46c] ss:$16 sps:$4 sm:$0xff]  }
 0x12e   :  { %2018 = vmatprep.subr.bf16.mxu1 %v5057_v41  ;;  %v5147_v41 = vld [vmem:[#allocation7 + $0x66c] ss:$16 sps:$4 sm:$0xff]  }
 0x130   :  { %1978 = vmatpush1.bf16.msra.mxu0 %v5052_v42  ;;  %v5142_v42 = vld [vmem:[#allocation7 + $0x468] ss:$16 sps:$4 sm:$0xff]  }
 0x131   :  { %2019 = vmatpush1.bf16.msra.mxu1 %v5055_v43  ;;  %1979 = vmatprep.subr.bf16.mxu0 %v5060_v44  ;;  %v5145_v43 = vld [vmem:[#allocation7 + $0x668] ss:$16 sps:$4 sm:$0xff]   ;;  %v5150_v44 = vld [vmem:[#allocation7 + $0x44c] ss:$16 sps:$4 sm:$0xff]  }
 0x132   :  { %2020 = vmatprep.subr.bf16.mxu1 %v5063_v45  ;;  %v5151_v45 = vld [vmem:[#allocation7 + $0x648] ss:$16 sps:$4 sm:$0xff]  }
 0x134   :  { %1980 = vmatpush1.bf16.msra.mxu0 %v5058_v46  ;;  %v5156_v46 = vld [vmem:[#allocation7 + $0x42c] ss:$16 sps:$4 sm:$0xff]  }
 0x135   :  { %2021 = vmatpush1.bf16.msra.mxu1 %v5061_v47  ;;  %1981 = vmatprep.subr.bf16.mxu0 %v5066_v48  ;;  %v5159_v47 = vld [vmem:[#allocation7 + $0x62c] ss:$16 sps:$4 sm:$0xff]   ;;  %v5154_v48 = vld [vmem:[#allocation7 + $0x428] ss:$16 sps:$4 sm:$0xff]  }
 0x136   :  { %2022 = vmatprep.subr.bf16.mxu1 %v5069_v50  ;;  %v5157_v50 = vld [vmem:[#allocation7 + $0x628] ss:$16 sps:$4 sm:$0xff]  }
 0x138   :  { %1982 = vmatpush1.bf16.msra.mxu0 %v5064_v51  ;;  %v5162_v51 = vld [vmem:[#allocation7 + $0x40c] ss:$16 sps:$4 sm:$0xff]  }
 0x139   :  { %2023 = vmatpush1.bf16.msra.mxu1 %v5067_v53  ;;  %1983 = vmatprep.subr.bf16.mxu0 %v5072_v54  ;;  %v5165_v53 = vld [vmem:[#allocation7 + $0x60c] ss:$16 sps:$4 sm:$0xff]   ;;  %v5160_v54 = vld [vmem:[#allocation7 + $0x408] ss:$16 sps:$4 sm:$0xff]  }
 0x13a   :  { %2024 = vmatprep.subr.bf16.mxu1 %v5075_v55  ;;  %v5163_v55 = vld [vmem:[#allocation7 + $0x608] ss:$16 sps:$4 sm:$0xff]  }
 0x13c   :  { %1984 = vmatpush2.bf16.msra.mxu0 %v5070_v56  ;;  %v5168_v56 = vld [vmem:[#allocation7 + $0x5ec] ss:$16 sps:$4 sm:$0xff]  }
 0x13d   :  { %2025 = vmatpush2.bf16.msra.mxu1 %v5073_v57  ;;  %1985 = vmatprep.subr.bf16.mxu0 %v5078_v58  ;;  %v5171_v57 = vld [vmem:[#allocation7 + $0x7ec] ss:$16 sps:$4 sm:$0xff]   ;;  %v5166_v58 = vld [vmem:[#allocation7 + $0x5e8] ss:$16 sps:$4 sm:$0xff]  }
 0x13e   :  { %2026 = vmatprep.subr.bf16.mxu1 %v5081_v59  ;;  %v5169_v59 = vld [vmem:[#allocation7 + $0x7e8] ss:$16 sps:$4 sm:$0xff]  }
 0x140   :  { %1986 = vmatpush2.bf16.msra.mxu0 %v5076_v60  ;;  %v5174_v60 = vld [vmem:[#allocation7 + $0x5cc] ss:$16 sps:$4 sm:$0xff]  }
 0x141   :  { %2027 = vmatpush2.bf16.msra.mxu1 %v5079_v61  ;;  %1987 = vmatprep.subr.bf16.mxu0 %v5084_v62  ;;  %v5177_v61 = vld [vmem:[#allocation7 + $0x7cc] ss:$16 sps:$4 sm:$0xff]   ;;  %v5172_v62 = vld [vmem:[#allocation7 + $0x5c8] ss:$16 sps:$4 sm:$0xff]  }
 0x142   :  { %2028 = vmatprep.subr.bf16.mxu1 %v5087_v63  ;;  %v5175_v63 = vld [vmem:[#allocation7 + $0x7c8] ss:$16 sps:$4 sm:$0xff]  }
 0x144   :  { %1988 = vmatpush2.bf16.msra.mxu0 %v5082_v0  ;;  %v5180_v0 = vld [vmem:[#allocation7 + $0x5ac] ss:$16 sps:$4 sm:$0xff]  }
 0x145   :  { %2029 = vmatpush2.bf16.msra.mxu1 %v5085_v1  ;;  %1989 = vmatprep.subr.bf16.mxu0 %v5090_v2  ;;  %v5183_v1 = vld [vmem:[#allocation7 + $0x7ac] ss:$16 sps:$4 sm:$0xff]   ;;  %v5178_v2 = vld [vmem:[#allocation7 + $0x5a8] ss:$16 sps:$4 sm:$0xff]  }
 0x146   :  { %2030 = vmatprep.subr.bf16.mxu1 %v5093_v3  ;;  %v5181_v3 = vld [vmem:[#allocation7 + $0x7a8] ss:$16 sps:$4 sm:$0xff]  }
 0x148   :  { %1990 = vmatpush2.bf16.msra.mxu0 %v5088_v4  ;;  %v5186_v4 = vld [vmem:[#allocation7 + $0x58c] ss:$16 sps:$4 sm:$0xff]  }
 0x149   :  { %2031 = vmatpush2.bf16.msra.mxu1 %v5091_v5  ;;  %1991 = vmatprep.subr.bf16.mxu0 %v5096_v6  ;;  %v5189_v5 = vld [vmem:[#allocation7 + $0x78c] ss:$16 sps:$4 sm:$0xff]   ;;  %v5184_v6 = vld [vmem:[#allocation7 + $0x588] ss:$16 sps:$4 sm:$0xff]  }
 0x14a   :  { %2032 = vmatprep.subr.bf16.mxu1 %v5099_v7  ;;  %v5187_v7 = vld [vmem:[#allocation7 + $0x788] ss:$16 sps:$4 sm:$0xff]  }
 0x14c   :  { %1992 = vmatpush2.bf16.msra.mxu0 %v5094_v10  ;;  %v5192_v10 = vld [vmem:[#allocation7 + $0x56c] ss:$16 sps:$4 sm:$0xff]  }
 0x14d   :  { %2033 = vmatpush2.bf16.msra.mxu1 %v5097_v11  ;;  %1993 = vmatprep.subr.bf16.mxu0 %v5102_v12  ;;  %v5195_v11 = vld [vmem:[#allocation7 + $0x76c] ss:$16 sps:$4 sm:$0xff]   ;;  %v5190_v12 = vld [vmem:[#allocation7 + $0x568] ss:$16 sps:$4 sm:$0xff]  }
 0x14e   :  { %2034 = vmatprep.subr.bf16.mxu1 %v5105_v13  ;;  %v5193_v13 = vld [vmem:[#allocation7 + $0x768] ss:$16 sps:$4 sm:$0xff]  }
 0x150   :  { %1994 = vmatpush2.bf16.msra.mxu0 %v5100_v14  ;;  %v5198_v14 = vld [vmem:[#allocation7 + $0x54c] ss:$16 sps:$4 sm:$0xff]  }
 0x151   :  { %2035 = vmatpush2.bf16.msra.mxu1 %v5103_v15  ;;  %1995 = vmatprep.subr.bf16.mxu0 %v5108_v16  ;;  %v5201_v15 = vld [vmem:[#allocation7 + $0x74c] ss:$16 sps:$4 sm:$0xff]   ;;  %v5196_v16 = vld [vmem:[#allocation7 + $0x548] ss:$16 sps:$4 sm:$0xff]  }
 0x152   :  { %2036 = vmatprep.subr.bf16.mxu1 %v5111_v17  ;;  %v5199_v17 = vld [vmem:[#allocation7 + $0x748] ss:$16 sps:$4 sm:$0xff]  }
 0x154   :  { %1996 = vmatpush2.bf16.msra.mxu0 %v5106_v18  ;;  %v5204_v18 = vld [vmem:[#allocation7 + $0x52c] ss:$16 sps:$4 sm:$0xff]  }
 0x155   :  { %2037 = vmatpush2.bf16.msra.mxu1 %v5109_v19  ;;  %1997 = vmatprep.subr.bf16.mxu0 %v5114_v22  ;;  %v5207_v19 = vld [vmem:[#allocation7 + $0x72c] ss:$16 sps:$4 sm:$0xff]   ;;  %v5202_v22 = vld [vmem:[#allocation7 + $0x528] ss:$16 sps:$4 sm:$0xff]  }
 0x156   :  { %2038 = vmatprep.subr.bf16.mxu1 %v5117_v23  ;;  %v5205_v23 = vld [vmem:[#allocation7 + $0x728] ss:$16 sps:$4 sm:$0xff]  }
 0x158   :  { %1998 = vmatpush2.bf16.msra.mxu0 %v5112_v24  ;;  %v5210_v24 = vld [vmem:[#allocation7 + $0x50c] ss:$16 sps:$4 sm:$0xff]  }
 0x159   :  { %2039 = vmatpush2.bf16.msra.mxu1 %v5115_v25  ;;  %2049 = vmatprep.subr.bf16.mxu0 %v5120_v26  ;;  %v5213_v25 = vld [vmem:[#allocation7 + $0x70c] ss:$16 sps:$4 sm:$0xff]   ;;  %v5208_v26 = vld [vmem:[#allocation7 + $0x508] ss:$16 sps:$4 sm:$0xff]  }
 0x15a   :  { %2090 = vmatprep.subr.bf16.mxu1 %v5123_v27  ;;  %v5211_v27 = vld [vmem:[#allocation7 + $0x708] ss:$16 sps:$4 sm:$0xff]  }
 0x15b   :  { %2000 = vmatmul.mubr.bf16.vlgmr.msra.gmra.mxu0 %v5984_v8  ;;  %v5141_v8 = vld [vmem:[#allocation7 + $0x68c] ss:$16 sps:$4 sm:$0xff]  }
 0x15c   :  { %2041 = vmatmul.mubr.bf16.vlgmr.msra.gmra.mxu1 %v5986_v9  ;;  %2050 = vmatpush1.bf16.msra.mxu0 %v5118_v28  ;;  %v5139_v9 = vld [vmem:[#allocation7 + $0x688] ss:$16 sps:$4 sm:$0xff]   ;;  %v5216_v28 = vld [vmem:[#allocation8 + $0x74] ss:$8 sps:$4 sm:$0xff]  }
 0x15d   :  { %2091 = vmatpush1.bf16.msra.mxu1 %v5121_v29  ;;  %2051 = vmatprep.subr.bf16.mxu0 %v5126_v30  ;;  %v5214_v29 = vld [vmem:[#allocation8 + $0x70] ss:$8 sps:$4 sm:$0xff]   ;;  %v5219_v30 = vld [vmem:[#allocation8 + $0x64] ss:$8 sps:$4 sm:$0xff]  }
 0x15e   :  { %2092 = vmatprep.subr.bf16.mxu1 %v5129_v31  ;;  %2081 = vmatprep.mubr.bf16.mxu0 %v5990_v37  ;;  %v5153_v37 = vld [vmem:[#allocation7 + $0x64c] ss:$16 sps:$4 sm:$0xff]   ;;  %v5217_v31 = vld [vmem:[#allocation8 + $0x60] ss:$8 sps:$4 sm:$0xff]  }
 0x15f   :  { %2122 = vmatprep.mubr.bf16.mxu1 %v5992_v40  ;;  %v5148_v40 = vld [vmem:[#allocation7 + $0x448] ss:$16 sps:$4 sm:$0xff]  }
 0x160   :  { %2052 = vmatpush1.bf16.msra.mxu0 %v5124_v32 }
 0x161   :  { %2093 = vmatpush1.bf16.msra.mxu1 %v5127_v33  ;;  %2053 = vmatprep.subr.bf16.mxu0 %v5132_v34  ;;  %v5222_v34 = vld [vmem:[#allocation8 + $0x54] ss:$8 sps:$4 sm:$0xff]  }
 0x162   :  { %2094 = vmatprep.subr.bf16.mxu1 %v5135_v35 }
 0x164   :  { %2054 = vmatpush1.bf16.msra.mxu0 %v5130_v36 }
 0x165   :  { %2095 = vmatpush1.bf16.msra.mxu1 %v5133_v38  ;;  %2055 = vmatprep.subr.bf16.mxu0 %v5138_v39  ;;  %v5220_v38 = vld [vmem:[#allocation8 + $0x50] ss:$8 sps:$4 sm:$0xff]  }
 0x166   :  { %2096 = vmatprep.subr.bf16.mxu1 %v5141_v8 }
 0x168   :  { %2056 = vmatpush1.bf16.msra.mxu0 %v5136_v49 }
 0x169   :  { %2097 = vmatpush1.bf16.msra.mxu1 %v5139_v9  ;;  %2057 = vmatprep.subr.bf16.mxu0 %v5144_v52  ;;  %v5225_v52 = vld [vmem:[#allocation8 + $0x44] ss:$8 sps:$4 sm:$0xff]  }
 0x16a   :  { %2098 = vmatprep.subr.bf16.mxu1 %v5147_v41  ;;  %v5262_v41 = vld [vmem:[#allocation8 + $0x170] ss:$8 sps:$4 sm:$0xff]  }
 0x16c   :  { %2058 = vmatpush1.bf16.msra.mxu0 %v5142_v42  ;;  %v5264_v42 = vld [vmem:[#allocation8 + $0x174] ss:$8 sps:$4 sm:$0xff]  }
 0x16d   :  { %2099 = vmatpush1.bf16.msra.mxu1 %v5145_v43  ;;  %2059 = vmatprep.subr.bf16.mxu0 %v5150_v44  ;;  %v5265_v43 = vld [vmem:[#allocation8 + $0x160] ss:$8 sps:$4 sm:$0xff]   ;;  %v5228_v44 = vld [vmem:[#allocation8 + $0x34] ss:$8 sps:$4 sm:$0xff]  }
 0x16e   :  { %2100 = vmatprep.subr.bf16.mxu1 %v5153_v37  ;;  %v5273_v37 = vld [vmem:[#allocation8 + $0x154] ss:$8 sps:$4 sm:$0xff]  }
 0x170   :  { %2060 = vmatpush1.bf16.msra.mxu0 %v5148_v40  ;;  %v5226_v40 = vld [vmem:[#allocation8 + $0x30] ss:$8 sps:$4 sm:$0xff]  }
 0x171   :  { %2101 = vmatpush1.bf16.msra.mxu1 %v5151_v45  ;;  %2061 = vmatprep.subr.bf16.mxu0 %v5156_v46  ;;  %v5271_v45 = vld [vmem:[#allocation8 + $0x150] ss:$8 sps:$4 sm:$0xff]   ;;  %v5231_v46 = vld [vmem:[#allocation8 + $0x24] ss:$8 sps:$4 sm:$0xff]  }
 0x172   :  { %2102 = vmatprep.subr.bf16.mxu1 %v5159_v47  ;;  %v5279_v47 = vld [vmem:[#allocation8 + $0x144] ss:$8 sps:$4 sm:$0xff]  }
 0x174   :  { %2062 = vmatpush1.bf16.msra.mxu0 %v5154_v48  ;;  %v5229_v48 = vld [vmem:[#allocation8 + $0x20] ss:$8 sps:$4 sm:$0xff]  }
 0x175   :  { %2103 = vmatpush1.bf16.msra.mxu1 %v5157_v50  ;;  %2063 = vmatprep.subr.bf16.mxu0 %v5162_v51  ;;  %v5277_v50 = vld [vmem:[#allocation8 + $0x140] ss:$8 sps:$4 sm:$0xff]   ;;  %v5234_v51 = vld [vmem:[#allocation8 + $0x14] ss:$8 sps:$4 sm:$0xff]  }
 0x176   :  { %2104 = vmatprep.subr.bf16.mxu1 %v5165_v53  ;;  %v5285_v53 = vld [vmem:[#allocation8 + $0x134] ss:$8 sps:$4 sm:$0xff]  }
 0x178   :  { %2064 = vmatpush1.bf16.msra.mxu0 %v5160_v54  ;;  %v5232_v54 = vld [vmem:[#allocation8 + $0x10] ss:$8 sps:$4 sm:$0xff]  }
 0x179   :  { %2105 = vmatpush1.bf16.msra.mxu1 %v5163_v55  ;;  %2065 = vmatprep.subr.bf16.mxu0 %v5168_v56  ;;  %v5283_v55 = vld [vmem:[#allocation8 + $0x130] ss:$8 sps:$4 sm:$0xff]   ;;  %v5237_v56 = vld [vmem:[#allocation8 + $0x4] ss:$8 sps:$4 sm:$0xff]  }
 0x17a   :  { %2106 = vmatprep.subr.bf16.mxu1 %v5171_v57  ;;  %v5291_v57 = vld [vmem:[#allocation8 + $0x124] ss:$8 sps:$4 sm:$0xff]  }
 0x17c   :  { %2066 = vmatpush2.bf16.msra.mxu0 %v5166_v58  ;;  %v5235_v58 = vld [vmem:[#allocation8] ss:$8 sps:$4 sm:$0xff]  }
 0x17d   :  { %2107 = vmatpush2.bf16.msra.mxu1 %v5169_v59  ;;  %2067 = vmatprep.subr.bf16.mxu0 %v5174_v60  ;;  %v5289_v59 = vld [vmem:[#allocation8 + $0x120] ss:$8 sps:$4 sm:$0xff]   ;;  %v5240_v60 = vld [vmem:[#allocation8 + $0xf4] ss:$8 sps:$4 sm:$0xff]  }
 0x17e   :  { %2108 = vmatprep.subr.bf16.mxu1 %v5177_v61  ;;  %v5297_v61 = vld [vmem:[#allocation8 + $0x114] ss:$8 sps:$4 sm:$0xff]  }
 0x180   :  { %2068 = vmatpush2.bf16.msra.mxu0 %v5172_v62  ;;  %v5238_v62 = vld [vmem:[#allocation8 + $0xf0] ss:$8 sps:$4 sm:$0xff]  }
 0x181   :  { %2109 = vmatpush2.bf16.msra.mxu1 %v5175_v63  ;;  %2069 = vmatprep.subr.bf16.mxu0 %v5180_v0  ;;  %v5295_v63 = vld [vmem:[#allocation8 + $0x110] ss:$8 sps:$4 sm:$0xff]   ;;  %v5243_v0 = vld [vmem:[#allocation8 + $0xe4] ss:$8 sps:$4 sm:$0xff]  }
 0x182   :  { %2110 = vmatprep.subr.bf16.mxu1 %v5183_v1  ;;  %v5303_v1 = vld [vmem:[#allocation8 + $0x104] ss:$8 sps:$4 sm:$0xff]  }
 0x184   :  { %2070 = vmatpush2.bf16.msra.mxu0 %v5178_v2  ;;  %v5241_v2 = vld [vmem:[#allocation8 + $0xe0] ss:$8 sps:$4 sm:$0xff]  }
 0x185   :  { %2111 = vmatpush2.bf16.msra.mxu1 %v5181_v3  ;;  %2071 = vmatprep.subr.bf16.mxu0 %v5186_v4  ;;  %v5301_v3 = vld [vmem:[#allocation8 + $0x100] ss:$8 sps:$4 sm:$0xff]   ;;  %v5246_v4 = vld [vmem:[#allocation8 + $0xd4] ss:$8 sps:$4 sm:$0xff]  }
 0x186   :  { %2112 = vmatprep.subr.bf16.mxu1 %v5189_v5  ;;  %v5309_v5 = vld [vmem:[#allocation8 + $0x1f4] ss:$8 sps:$4 sm:$0xff]  }
 0x188   :  { %2072 = vmatpush2.bf16.msra.mxu0 %v5184_v6  ;;  %v5244_v6 = vld [vmem:[#allocation8 + $0xd0] ss:$8 sps:$4 sm:$0xff]  }
 0x189   :  { %2113 = vmatpush2.bf16.msra.mxu1 %v5187_v7  ;;  %2073 = vmatprep.subr.bf16.mxu0 %v5192_v10  ;;  %v5307_v7 = vld [vmem:[#allocation8 + $0x1f0] ss:$8 sps:$4 sm:$0xff]   ;;  %v5249_v10 = vld [vmem:[#allocation8 + $0xc4] ss:$8 sps:$4 sm:$0xff]  }
 0x18a   :  { %2114 = vmatprep.subr.bf16.mxu1 %v5195_v11  ;;  %v5315_v11 = vld [vmem:[#allocation8 + $0x1e4] ss:$8 sps:$4 sm:$0xff]  }
 0x18c   :  { %2074 = vmatpush2.bf16.msra.mxu0 %v5190_v12  ;;  %v5247_v12 = vld [vmem:[#allocation8 + $0xc0] ss:$8 sps:$4 sm:$0xff]  }
 0x18d   :  { %2115 = vmatpush2.bf16.msra.mxu1 %v5193_v13  ;;  %2075 = vmatprep.subr.bf16.mxu0 %v5198_v14  ;;  %v5313_v13 = vld [vmem:[#allocation8 + $0x1e0] ss:$8 sps:$4 sm:$0xff]   ;;  %v5252_v14 = vld [vmem:[#allocation8 + $0xb4] ss:$8 sps:$4 sm:$0xff]  }
 0x18e   :  { %2116 = vmatprep.subr.bf16.mxu1 %v5201_v15  ;;  %v5321_v15 = vld [vmem:[#allocation8 + $0x1d4] ss:$8 sps:$4 sm:$0xff]  }
 0x190   :  { %2076 = vmatpush2.bf16.msra.mxu0 %v5196_v16  ;;  %v503_v16 = vlaneseq }
 0x191   :  { %2117 = vmatpush2.bf16.msra.mxu1 %v5199_v17  ;;  %2077 = vmatprep.subr.bf16.mxu0 %v5204_v18  ;;  %v5250_v17 = vld [vmem:[#allocation8 + $0xb0] ss:$8 sps:$4 sm:$0xff]  }
 0x192   :  { %2118 = vmatprep.subr.bf16.mxu1 %v5207_v19  ;;  %v5319_v18 = vld [vmem:[#allocation8 + $0x1d0] ss:$8 sps:$4 sm:$0xff]   ;;  %v5255_v19 = vld [vmem:[#allocation8 + $0xa4] ss:$8 sps:$4 sm:$0xff]  }
 0x194   :  { %2078 = vmatpush2.bf16.msra.mxu0 %v5202_v22  ;;  %v5327_v22 = vld [vmem:[#allocation8 + $0x1c4] ss:$8 sps:$4 sm:$0xff]  }
 0x195   :  { %2119 = vmatpush2.bf16.msra.mxu1 %v5205_v23  ;;  %2079 = vmatprep.subr.bf16.mxu0 %v5210_v24  ;;  %v6018_v23 = vshrl.u32 %v503_v16, 7  ;;  %v5253_v24 = vld [vmem:[#allocation8 + $0xa0] ss:$8 sps:$4 sm:$0xff]   ;;  %v5318_v16 = vld [vmem:[#allocation10 + $0xf4] ss:$8 sps:$4 sm:$0xff]  }
 0x196   :  { %2120 = vmatprep.subr.bf16.mxu1 %v5213_v25  ;;  %v5325_v25 = vld [vmem:[#allocation8 + $0x1c0] ss:$8 sps:$4 sm:$0xff]  }
 0x198   :  { %2080 = vmatpush2.bf16.msra.mxu0 %v5208_v26  ;;  %v5258_v26 = vld [vmem:[#allocation8 + $0x94] ss:$8 sps:$4 sm:$0xff]  }
 0x199   :  { %2121 = vmatpush2.bf16.msra.mxu1 %v5211_v27  ;;  %2535 = vmatprep.subr.bf16.mxu0 %v5216_v28  ;;  %v5333_v27 = vld [vmem:[#allocation8 + $0x1b4] ss:$8 sps:$4 sm:$0xff]   ;;  %v6021_v28 = vsub.s32 0, %v6018_v23 }
 0x19a   :  { %2576 = vmatprep.subr.bf16.mxu1 %v5264_v42 }
 0x19b   :  { %v6008_v32 = vpop.f32.mrf.mxu0  ;;  %2082 = vmatmul.mubr.bf16.vlgmr.msra.gmra.mxu0 %v5996_v20  ;;  %v5267_v20 = vld [vmem:[#allocation8 + $0x164] ss:$8 sps:$4 sm:$0xff]  }
 0x19c   :  { %v6010_v33 = vpop.f32.mrf.mxu1  ;;  %2123 = vmatmul.mubr.bf16.vlgmr.msra.gmra.mxu1 %v5998_v21  ;;  %2536 = vmatpush1.bf16.msra.mxu0 %v5214_v29  ;;  %v5223_v21 = vld [vmem:[#allocation8 + $0x40] ss:$8 sps:$4 sm:$0xff]  }
 0x19d   :  { %v6014_v35 = vpop.f32.mrf.mxu0  ;;  %2537 = vmatprep.subr.bf16.mxu0 %v5219_v30  ;;  %2577 = vmatpush1.bf16.msra.mxu1 %v5262_v41  ;;  %v6026_v29 = vld [vmem:[%s6147_s22] sm:$0xf]  ;;  %v6029_v30 = vsub.s32 1, %v6018_v23  ;;  %v5270_v41 = vld [vmem:[#allocation10 + $0x74] ss:$8 sps:$4 sm:$0xff]  }
 0x19e   :  { %v6016_v36 = vpop.f32.mrf.mxu1  ;;  %2578 = vmatprep.subr.bf16.mxu1 %v5267_v20 }
 0x19f   :  { %v1841_v39 = vpop.f32.mrf.mxu0 }
 0x1a0   :  { %v1882_v8 = vpop.f32.mrf.mxu1  ;;  %2538 = vmatpush1.bf16.msra.mxu0 %v5217_v31  ;;  %v5256_v31 = vld [vmem:[#allocation8 + $0x90] ss:$8 sps:$4 sm:$0xff]   ;;  %v5339_v39 = vld [vmem:[#allocation8 + $0x1a4] ss:$8 sps:$4 sm:$0xff]  }
 0x1a1   :  { %v1842_v49 = vpop.f32.mrf.mxu0  ;;  %2539 = vmatprep.subr.bf16.mxu0 %v5222_v34  ;;  %2579 = vmatpush1.bf16.msra.mxu1 %v5265_v43  ;;  %v5331_v34 = vld [vmem:[#allocation8 + $0x1b0] ss:$8 sps:$4 sm:$0xff]   ;;  %v506_v8 = vrot.slane %v6026_v29, %v6021_v28 }
 0x1a2   :  { %v1883_v9 = vpop.f32.mrf.mxu1  ;;  %2580 = vmatprep.subr.bf16.mxu1 %v5273_v37  ;;  %v510_v49 = vrot.slane %v6026_v29, %v6029_v30 }
 0x1a3   :  { %v5259_v9 = vld [vmem:[#allocation8 + $0x80] ss:$8 sps:$4 sm:$0xff]   ;;  %v1838_v42 = vadd.f32 %v6008_v32, %v506_v8 }
 0x1a4   :  { %2540 = vmatpush1.bf16.msra.mxu0 %v5220_v38  ;;  %v5261_v38 = vld [vmem:[#allocation8 + $0x84] ss:$8 sps:$4 sm:$0xff]   ;;  %v1840_v20 = vadd.f32 %v6014_v35, %v510_v49 }
 0x1a5   :  { %2541 = vmatprep.subr.bf16.mxu0 %v5225_v52  ;;  %2581 = vmatpush1.bf16.msra.mxu1 %v5271_v45  ;;  %v5337_v52 = vld [vmem:[#allocation8 + $0x1a0] ss:$8 sps:$4 sm:$0xff]   ;;  %v5345_v45 = vld [vmem:[#allocation8 + $0x194] ss:$8 sps:$4 sm:$0xff]  }
 0x1a6   :  { %2582 = vmatprep.subr.bf16.mxu1 %v5279_v47  ;;  %v1881_v37 = vadd.f32 %v6016_v36, %v1840_v20 }
 0x1a8   :  { %2542 = vmatpush1.bf16.msra.mxu0 %v5223_v21  ;;  %v1879_v21 = vadd.f32 %v6010_v33, %v1838_v42  ;;  %v5357_v42 = vld [vmem:[#allocation10 + $0x84] ss:$8 sps:$4 sm:$0xff]  }
 0x1a9   :  { %2543 = vmatprep.subr.bf16.mxu0 %v5228_v44  ;;  %2583 = vmatpush1.bf16.msra.mxu1 %v5277_v50 }
 0x1aa   :  { %2584 = vmatprep.subr.bf16.mxu1 %v5285_v53 }
 0x1ac   :  { %2544 = vmatpush1.bf16.msra.mxu0 %v5226_v40 }
 0x1ad   :  { %2545 = vmatprep.subr.bf16.mxu0 %v5231_v46  ;;  %2585 = vmatpush1.bf16.msra.mxu1 %v5283_v55 }
 0x1ae   :  { %2586 = vmatprep.subr.bf16.mxu1 %v5291_v57  ;;  %v5349_v57 = vld [vmem:[#allocation8 + $0x180] ss:$8 sps:$4 sm:$0xff]  }
 0x1b0   :  { %2546 = vmatpush1.bf16.msra.mxu0 %v5229_v48  ;;  %v5343_v48 = vld [vmem:[#allocation8 + $0x190] ss:$8 sps:$4 sm:$0xff]  }
 0x1b1   :  { %2547 = vmatprep.subr.bf16.mxu0 %v5234_v51  ;;  %2587 = vmatpush1.bf16.msra.mxu1 %v5289_v59  ;;  %v5268_v59 = vld [vmem:[#allocation10 + $0x70] ss:$8 sps:$4 sm:$0xff]  }
 0x1b2   :  { %2588 = vmatprep.subr.bf16.mxu1 %v5297_v61 }
 0x1b4   :  { %2548 = vmatpush1.bf16.msra.mxu0 %v5232_v54  ;;  %v5351_v54 = vld [vmem:[#allocation8 + $0x184] ss:$8 sps:$4 sm:$0xff]  }
 0x1b5   :  { %2549 = vmatprep.subr.bf16.mxu0 %v5237_v56  ;;  %2589 = vmatpush1.bf16.msra.mxu1 %v5295_v63  ;;  %v2620_v63 = vld [vmem:[#allocation5 + $0x8] sm:$0xff] }
 0x1b6   :  { %2590 = vmatprep.subr.bf16.mxu1 %v5303_v1  ;;  %v2623_v1 = vpack.c.bf16 %v2620_v63, %v2620_v63 }
 0x1b8   :  { %2550 = vmatpush1.bf16.msra.mxu0 %v5235_v58 }
 0x1b9   :  { %2551 = vmatprep.subr.bf16.mxu0 %v5240_v60  ;;  %2591 = vmatpush1.bf16.msra.mxu1 %v5301_v3  ;;  %v5358_v60 = vld [vmem:[#allocation10 + $0x124] ss:$8 sps:$4 sm:$0x3f]   ;;  %v5280_v3 = vld [vmem:[#allocation10 + $0x50] ss:$8 sps:$4 sm:$0xff]  }
 0x1ba   :  { %2592 = vmatprep.subr.bf16.mxu1 %v5309_v5  ;;  %v5286_v5 = vld [vmem:[#allocation10 + $0x40] ss:$8 sps:$4 sm:$0xff]  }
 0x1bc   :  { %2552 = vmatpush2.bf16.msra.mxu0 %v5238_v62  ;;  %v5276_v62 = vld [vmem:[#allocation10 + $0x64] ss:$8 sps:$4 sm:$0xff]  }
 0x1bd   :  { %2553 = vmatprep.subr.bf16.mxu0 %v5243_v0  ;;  %2593 = vmatpush2.bf16.msra.mxu1 %v5307_v7  ;;  %v5274_v0 = vld [vmem:[#allocation10 + $0x60] ss:$8 sps:$4 sm:$0xff]   ;;  %v5292_v7 = vld [vmem:[#allocation10 + $0x30] ss:$8 sps:$4 sm:$0xff]  }
 0x1be   :  { %2594 = vmatprep.subr.bf16.mxu1 %v5315_v11  ;;  %v5298_v11 = vld [vmem:[#allocation10 + $0x20] ss:$8 sps:$4 sm:$0xff]  }
 0x1c0   :  { %2554 = vmatpush2.bf16.msra.mxu0 %v5241_v2  ;;  %v5282_v2 = vld [vmem:[#allocation10 + $0x54] ss:$8 sps:$4 sm:$0xff]  }
 0x1c1   :  { %2555 = vmatprep.subr.bf16.mxu0 %v5246_v4  ;;  %2595 = vmatpush2.bf16.msra.mxu1 %v5313_v13  ;;  %v5288_v4 = vld [vmem:[#allocation10 + $0x44] ss:$8 sps:$4 sm:$0xff]   ;;  %v5304_v13 = vld [vmem:[#allocation10 + $0x10] ss:$8 sps:$4 sm:$0xff]  }
 0x1c2   :  { %2596 = vmatprep.subr.bf16.mxu1 %v5321_v15  ;;  %v5310_v15 = vld [vmem:[#allocation10] ss:$8 sps:$4 sm:$0xff]  }
 0x1c4   :  { %2556 = vmatpush2.bf16.msra.mxu0 %v5244_v6  ;;  %v5294_v6 = vld [vmem:[#allocation10 + $0x34] ss:$8 sps:$4 sm:$0xff]  }
 0x1c5   :  { %2557 = vmatprep.subr.bf16.mxu0 %v5249_v10  ;;  %2597 = vmatpush2.bf16.msra.mxu1 %v5319_v18  ;;  %v5300_v10 = vld [vmem:[#allocation10 + $0x24] ss:$8 sps:$4 sm:$0xff]  }
 0x1c6   :  { %2598 = vmatprep.subr.bf16.mxu1 %v5327_v22  ;;  %v5324_v18 = vld [vmem:[#allocation10 + $0xe4] ss:$8 sps:$4 sm:$0xff]   ;;  %v5330_v22 = vld [vmem:[#allocation10 + $0xd4] ss:$8 sps:$4 sm:$0xff]  }
 0x1c8   :  { %2558 = vmatpush2.bf16.msra.mxu0 %v5247_v12  ;;  %v5306_v12 = vld [vmem:[#allocation10 + $0x14] ss:$8 sps:$4 sm:$0xff]  }
 0x1c9   :  { %2559 = vmatprep.subr.bf16.mxu0 %v5252_v14  ;;  %2599 = vmatpush2.bf16.msra.mxu1 %v5325_v25  ;;  %v5312_v14 = vld [vmem:[#allocation10 + $0x4] ss:$8 sps:$4 sm:$0xff]  }
 0x1ca   :  { %2600 = vmatprep.subr.bf16.mxu1 %v5333_v27  ;;  %v5336_v25 = vld [vmem:[#allocation10 + $0xc4] ss:$8 sps:$4 sm:$0xff]   ;;  %v5342_v27 = vld [vmem:[#allocation10 + $0xb4] ss:$8 sps:$4 sm:$0xff]  }
 0x1cc   :  { %2560 = vmatpush2.bf16.msra.mxu0 %v5250_v17  ;;  %v5316_v17 = vld [vmem:[#allocation10 + $0xf0] ss:$8 sps:$4 sm:$0xff]  }
 0x1cd   :  { %2561 = vmatprep.subr.bf16.mxu0 %v5255_v19  ;;  %2601 = vmatpush2.bf16.msra.mxu1 %v5331_v34  ;;  %v5322_v19 = vld [vmem:[#allocation10 + $0xe0] ss:$8 sps:$4 sm:$0xff]   ;;  %v5348_v34 = vld [vmem:[#allocation10 + $0xa4] ss:$8 sps:$4 sm:$0xff]  }
 0x1ce   :  { %2602 = vmatprep.subr.bf16.mxu1 %v5339_v39  ;;  %v5354_v39 = vld [vmem:[#allocation10 + $0x94] ss:$8 sps:$4 sm:$0xff]  }
 0x1d0   :  { %2562 = vmatpush2.bf16.msra.mxu0 %v5253_v24  ;;  %v5328_v24 = vld [vmem:[#allocation10 + $0xd0] ss:$8 sps:$4 sm:$0xff]  }
 0x1d1   :  { %2563 = vmatprep.subr.bf16.mxu0 %v5258_v26  ;;  %2603 = vmatpush2.bf16.msra.mxu1 %v5337_v52  ;;  %v5334_v26 = vld [vmem:[#allocation10 + $0xc0] ss:$8 sps:$4 sm:$0xff]  }
 0x1d2   :  { %2604 = vmatprep.subr.bf16.mxu1 %v5345_v45 }
 0x1d4   :  { %2564 = vmatpush2.bf16.msra.mxu0 %v5256_v31  ;;  %v5340_v31 = vld [vmem:[#allocation10 + $0xb0] ss:$8 sps:$4 sm:$0xff]  }
 0x1d5   :  { %2565 = vmatprep.subr.bf16.mxu0 %v5261_v38  ;;  %2605 = vmatpush2.bf16.msra.mxu1 %v5343_v48  ;;  %v5346_v38 = vld [vmem:[#allocation10 + $0xa0] ss:$8 sps:$4 sm:$0xff]  }
 0x1d6   :  { %2606 = vmatprep.subr.bf16.mxu1 %v5351_v54 }
 0x1d8   :  { %2566 = vmatpush2.bf16.msra.mxu0 %v5259_v9  ;;  %v5352_v9 = vld [vmem:[#allocation10 + $0x90] ss:$8 sps:$4 sm:$0xff]  }
 0x1d9   :  { %2874 = vmatprep.subr.bf16.mxu0 %v5270_v41  ;;  %2607 = vmatpush2.bf16.msra.mxu1 %v5349_v57 }
 0x1da   :  { %4543 = vmatprep.subr.msk.bf16.mxu1 %vm2867_vm0, %v5358_v60 }
 0x1db   :  { %v1919_v43 = vpop.f32.mrf.mxu0 }
 0x1dc   :  { %v1960_v44 = vpop.f32.mrf.mxu1  ;;  %v1920_v40 = vadd.f32 %v1919_v43, %v1879_v21  ;;  %v5355_v43 = vld [vmem:[#allocation10 + $0x80] ss:$8 sps:$4 sm:$0xff]  }
 0x1dd   :  { %v1921_v46 = vpop.f32.mrf.mxu0 }
 0x1de   :  { %v1962_v47 = vpop.f32.mrf.mxu1  ;;  %v1961_v50 = vadd.f32 %v1960_v44, %v1920_v40  ;;  %v1922_v51 = vadd.f32 %v1921_v46, %v1881_v37  ;;  %v2619_v44 = vld [vmem:[#allocation5] sm:$0xff]  ;;  %v513_v46 = vsub.s32 2, %v6018_v23 }
 0x1df   :  { %v1923_v32 = vpop.f32.mrf.mxu0  ;;  %v2622_v45 = vpack.c.bf16 %v2619_v44, %v2619_v44 }
 0x1e0   :  { %v1964_v53 = vpop.f32.mrf.mxu1  ;;  %v1963_v35 = vadd.f32 %v1962_v47, %v1922_v51  ;;  %v2131_v55 = vmax.f32 %v1961_v50, 0.0  ;;  %v517_v47 = vsub.s32 3, %v6018_v23  ;;  %v514_v48 = vrot.slane %v6026_v29, %v513_v46 }
 0x1e1   :  { %v1924_v56 = vpop.f32.mrf.mxu0 }
 0x1e2   :  { %v1965_v33 = vpop.f32.mrf.mxu1  ;;  %v2132_v58 = vmax.f32 %v1963_v35, 0.0  ;;  %v2135_v61 = vpack.c.bf16 %v2131_v55, %v2131_v55  ;;  %v518_v50 = vrot.slane %v6026_v29, %v517_v47  ;;  %v5406_v47 = vld [vmem:[#allocation11 + $0xa0] ss:$8 sps:$4 sm:$0xff]  }
 0x1e4   :  { %v2136_v36 = vpack.c.bf16 %v2132_v58, %v2132_v58 }
 0x1e6   :  { %2567 = vmatprep.mubr.bf16.mxu0 %v2136_v36 }
 0x1e7   :  { %2568 = vmatmul.mubr.bf16.vlgmr.msra.gmra.mxu0 %v2135_v61 }
 0x1e8   :  { %2875 = vmatpush1.bf16.msra.mxu0 %v5268_v59  ;;  %2906 = vmatprep.mubr.bf16.mxu0 %v2623_v1 }
 0x1e9   :  { %2876 = vmatprep.subr.bf16.mxu0 %v5276_v62 }
 0x1ec   :  { %2877 = vmatpush1.bf16.msra.mxu0 %v5274_v0  ;;  %v5360_v0 = vld [vmem:[#allocation10 + $0x120] ss:$8 sps:$4 sm:$0x3f]  }
 0x1ed   :  { %2878 = vmatprep.subr.bf16.mxu0 %v5282_v2 }
 0x1f0   :  { %2879 = vmatpush1.bf16.msra.mxu0 %v5280_v3  ;;  %v2869_v3 = vsel %vm2867_vm0, %v5360_v0, 0 }
 0x1f1   :  { %2880 = vmatprep.subr.bf16.mxu0 %v5288_v4  ;;  %v5363_v4 = vld [vmem:[#allocation10 + $0x114] ss:$8 sps:$4 sm:$0xff]  }
 0x1f4   :  { %2881 = vmatpush1.bf16.msra.mxu0 %v5286_v5  ;;  %v5361_v5 = vld [vmem:[#allocation10 + $0x110] ss:$8 sps:$4 sm:$0xff]  }
 0x1f5   :  { %2882 = vmatprep.subr.bf16.mxu0 %v5294_v6  ;;  %v5801_v6 = vmov 0  }
 0x1f8   :  { %2883 = vmatpush1.bf16.msra.mxu0 %v5292_v7  ;;  %v5366_v7 = vld [vmem:[#allocation10 + $0x104] ss:$8 sps:$4 sm:$0xff]  }
 0x1f9   :  { %2884 = vmatprep.subr.bf16.mxu0 %v5300_v10  ;;  %v5364_v10 = vld [vmem:[#allocation10 + $0x100] ss:$8 sps:$4 sm:$0xff]  }
 0x1fc   :  { %2885 = vmatpush1.bf16.msra.mxu0 %v5298_v11  ;;  %v2621_v11 = vld [vmem:[#allocation5 + $0x10] sm:$0xff] }
 0x1fd   :  { %2886 = vmatprep.subr.bf16.mxu0 %v5306_v12  ;;  %v5369_v12 = vld [vmem:[#allocation11 + $0x74] ss:$8 sps:$4 sm:$0xff]  }
 0x200   :  { %2887 = vmatpush1.bf16.msra.mxu0 %v5304_v13  ;;  %v2624_v13 = vpack.c.bf16 %v2621_v11, %v2621_v11 }
 0x201   :  { %2888 = vmatprep.subr.bf16.mxu0 %v5312_v14  ;;  %v5367_v14 = vld [vmem:[#allocation11 + $0x70] ss:$8 sps:$4 sm:$0xff]  }
 0x204   :  { %2889 = vmatpush1.bf16.msra.mxu0 %v5310_v15  ;;  %v5372_v15 = vld [vmem:[#allocation11 + $0x64] ss:$8 sps:$4 sm:$0xff]  }
 0x205   :  { %2890 = vmatprep.subr.bf16.mxu0 %v5318_v16  ;;  %v5370_v16 = vld [vmem:[#allocation11 + $0x60] ss:$8 sps:$4 sm:$0xff]  }
 0x208   :  { %2891 = vmatpush2.bf16.msra.mxu0 %v5316_v17  ;;  %v5375_v17 = vld [vmem:[#allocation11 + $0x54] ss:$8 sps:$4 sm:$0xff]  }
 0x209   :  { %2892 = vmatprep.subr.bf16.mxu0 %v5324_v18  ;;  %v5373_v18 = vld [vmem:[#allocation11 + $0x50] ss:$8 sps:$4 sm:$0xff]  }
 0x20c   :  { %2893 = vmatpush2.bf16.msra.mxu0 %v5322_v19  ;;  %v5378_v19 = vld [vmem:[#allocation11 + $0x44] ss:$8 sps:$4 sm:$0xff]  }
 0x20d   :  { %2894 = vmatprep.subr.bf16.mxu0 %v5330_v22  ;;  %v5376_v22 = vld [vmem:[#allocation11 + $0x40] ss:$8 sps:$4 sm:$0xff]  }
 0x210   :  { %2895 = vmatpush2.bf16.msra.mxu0 %v5328_v24  ;;  %v5381_v24 = vld [vmem:[#allocation11 + $0x34] ss:$8 sps:$4 sm:$0xff]  }
 0x211   :  { %2896 = vmatprep.subr.bf16.mxu0 %v5336_v25  ;;  %v5379_v25 = vld [vmem:[#allocation11 + $0x30] ss:$8 sps:$4 sm:$0xff]  }
 0x214   :  { %2897 = vmatpush2.bf16.msra.mxu0 %v5334_v26  ;;  %v5384_v26 = vld [vmem:[#allocation11 + $0x24] ss:$8 sps:$4 sm:$0xff]  }
 0x215   :  { %2898 = vmatprep.subr.bf16.mxu0 %v5342_v27  ;;  %v5382_v27 = vld [vmem:[#allocation11 + $0x20] ss:$8 sps:$4 sm:$0xff]  }
 0x218   :  { %2899 = vmatpush2.bf16.msra.mxu0 %v5340_v31  ;;  %v5387_v31 = vld [vmem:[#allocation11 + $0x14] ss:$8 sps:$4 sm:$0xff]  }
 0x219   :  { %2900 = vmatprep.subr.bf16.mxu0 %v5348_v34  ;;  %v5385_v34 = vld [vmem:[#allocation11 + $0x10] ss:$8 sps:$4 sm:$0xff]  }
 0x21b   :  { %v2001_v8 = vpop.f32.mrf.mxu0 }
 0x21c   :  { %v2042_v49 = vpop.f32.mrf.mxu1  ;;  %2901 = vmatpush2.bf16.msra.mxu0 %v5346_v38  ;;  %v2002_v51 = vadd.f32 %v2001_v8, %v514_v48  ;;  %v5390_v38 = vld [vmem:[#allocation11 + $0x4] ss:$8 sps:$4 sm:$0xff]   ;;  %v5393_v8 = vld [vmem:[#allocation11 + $0xf4] ss:$8 sps:$4 sm:$0xff]  }
 0x21d   :  { %v2003_v52 = vpop.f32.mrf.mxu0  ;;  %2902 = vmatprep.subr.bf16.mxu0 %v5354_v39  ;;  %v5388_v39 = vld [vmem:[#allocation11] ss:$8 sps:$4 sm:$0xff]   ;;  %v5408_v48 = vld [vmem:[#allocation11 + $0xa4] ss:$8 sps:$4 sm:$0xff]  }
 0x21e   :  { %v2044_v41 = vpop.f32.mrf.mxu1  ;;  %v2004_v32 = vadd.f32 %v2003_v52, %v518_v50  ;;  %v2043_v53 = vadd.f32 %v2042_v49, %v2002_v51  ;;  %v5391_v49 = vld [vmem:[#allocation11 + $0xf0] ss:$8 sps:$4 sm:$0xff]   ;;  %v5394_v52 = vld [vmem:[#allocation11 + $0xe0] ss:$8 sps:$4 sm:$0xff]   ;;  %v5411_v50 = vld [vmem:[#allocation11 + $0x94] ss:$8 sps:$4 sm:$0xff]  }
 0x21f   :  { %v2005_v20 = vpop.f32.mrf.mxu0  ;;  %v5409_v51 = vld [vmem:[#allocation11 + $0x90] ss:$8 sps:$4 sm:$0xff]  }
 0x220   :  { %v2046_v21 = vpop.f32.mrf.mxu1  ;;  %2903 = vmatpush2.bf16.msra.mxu0 %v5352_v9  ;;  %v2045_v55 = vadd.f32 %v2044_v41, %v2004_v32  ;;  %v5396_v9 = vld [vmem:[#allocation11 + $0xe4] ss:$8 sps:$4 sm:$0xff]   ;;  %v5399_v41 = vld [vmem:[#allocation11 + $0xd4] ss:$8 sps:$4 sm:$0xff]  }
 0x221   :  { %v2006_v37 = vpop.f32.mrf.mxu0  ;;  %2904 = vmatprep.subr.bf16.mxu0 %v5357_v42  ;;  %v5397_v42 = vld [vmem:[#allocation11 + $0xd0] ss:$8 sps:$4 sm:$0xff]   ;;  %v5402_v20 = vld [vmem:[#allocation11 + $0xc4] ss:$8 sps:$4 sm:$0xff]  }
 0x222   :  { %v2047_v40 = vpop.f32.mrf.mxu1  ;;  %v5405_v37 = vld [vmem:[#allocation11 + $0xb4] ss:$8 sps:$4 sm:$0xff]   ;;  %v5414_v32 = vld [vmem:[#allocation11 + $0x84] ss:$8 sps:$4 sm:$0xff]  }
 0x224   :  { %2905 = vmatpush2.bf16.msra.mxu0 %v5355_v43  ;;  %v5400_v43 = vld [vmem:[#allocation11 + $0xc0] ss:$8 sps:$4 sm:$0xff]  }
 0x227   :  { %2907 = vmatmul.mubr.bf16.vlgmr.msra.gmra.mxu0 %v2622_v45  ;;  %v5403_v45 = vld [vmem:[#allocation11 + $0xb0] ss:$8 sps:$4 sm:$0xff]  }
 0x25b   :  { %v2083_v35 = vpop.f32.mrf.mxu0 }
 0x25c   :  { %v2124_v54 = vpop.f32.mrf.mxu1  ;;  %v2084_v56 = vadd.f32 %v2083_v35, %v2043_v53  ;;  %v5412_v53 = vld [vmem:[#allocation11 + $0x80] ss:$8 sps:$4 sm:$0xff]   ;;  %v5415_v35 = vld [vmem:[#allocation13 + $0x78] sm:$0xff]  }
 0x25d   :  { %v2085_v33 = vpop.f32.mrf.mxu0 }
 0x25e   :  { %v2126_v57 = vpop.f32.mrf.mxu1  ;;  %v2125_v58 = vadd.f32 %v2124_v54, %v2084_v56  ;;  %v2086_v36 = vadd.f32 %v2085_v33, %v2045_v55  ;;  %v5431_v54 = vld [vmem:[#allocation14 + $0x78] sm:$0xff]   ;;  %v5433_v56 = vld [vmem:[#allocation14 + $0x70] sm:$0xff]  }
 0x25f   :  { %v2087_v59 = vpop.f32.mrf.mxu0  ;;  %v5432_v55 = vld [vmem:[#allocation14 + $0x38] sm:$0xff]   ;;  %4662 = vmatprep.subr.bf16.mxu0 %v5431_v54  ;;  %v5434_v33 = vld [vmem:[#allocation14 + $0x30] sm:$0xff]   ;;  %v5443_v54 = vld [vmem:[#allocation14 + $0x48] sm:$0xff]  }
 0x260   :  { %v2128_v60 = vpop.f32.mrf.mxu1  ;;  %v2127_v61 = vadd.f32 %v2126_v57, %v2086_v36  ;;  %v2133_v62 = vmax.f32 %v2125_v58, 0.0  ;;  %4663 = vmatpush3.bf16.msra.mxu0 %v5432_v55  ;;  %v5435_v57 = vld [vmem:[#allocation14 + $0x68] sm:$0xff]   ;;  %v5437_v36 = vld [vmem:[#allocation14 + $0x60] sm:$0xff]  }
 0x261   :  { %v2088_v23 = vpop.f32.mrf.mxu0  ;;  %4664 = vmatprep.subr.bf16.mxu0 %v5433_v56  ;;  %v5436_v58 = vld [vmem:[#allocation14 + $0x28] sm:$0xff]   ;;  %v5438_v60 = vld [vmem:[#allocation14 + $0x20] sm:$0xff]  }
 0x262   :  { %v2129_v63 = vpop.f32.mrf.mxu1  ;;  %v2134_v1 = vmax.f32 %v2127_v61, 0.0  ;;  %v2137_v2 = vpack.c.bf16 %v2133_v62, %v2133_v62  ;;  %v5439_v62 = vld [vmem:[#allocation14 + $0x58] sm:$0xff]   ;;  %v5444_v55 = vld [vmem:[#allocation14 + $0x8] sm:$0xff]   ;;  %v5445_v56 = vld [vmem:[#allocation14 + $0x40] sm:$0xff]  }
 0x263   :  { %v5440_v63 = vld [vmem:[#allocation14 + $0x18] sm:$0xff]  }
 0x264   :  { %v2138_v29 = vpack.c.bf16 %v2134_v1, %v2134_v1  ;;  %4665 = vmatpush3.bf16.msra.mxu0 %v5434_v33  ;;  %v5441_v1 = vld [vmem:[#allocation14 + $0x50] sm:$0xff]   ;;  %v5802_v33 = vmov 0.0  }
 0x265   :  { %4666 = vmatprep.subr.bf16.mxu0 %v5435_v57  ;;  %v2992_v57 = vld [vmem:[%s6124_s9] sm:$0x3] }
 0x266   :  { %2608 = vmatprep.mubr.bf16.mxu1 %v2138_v29  ;;  %v5442_v29 = vld [vmem:[#allocation14 + $0x10] sm:$0xff]  }
 0x267   :  { %2609 = vmatmul.mubr.bf16.vlgmr.msra.gmra.mxu1 %v2137_v2 }
 0x268   :  { %2926 = vmatpush1.bf16.msra.mxu1 %v2869_v3  ;;  %2947 = vmatprep.mubr.bf16.mxu1 %v5801_v6 }
 0x269   :  { %2927 = vmatprep.subr.bf16.mxu1 %v5363_v4  ;;  %4667 = vmatpush3.bf16.msra.mxu0 %v5436_v58  ;;  %v2663_v4 = vld [vmem:[%s6122_s7] sm:$0x3]  ;;  %v2997_v58 = vrot.slane %v2992_v57, %v6021_v28 }
 0x26a   :  { %4668 = vmatprep.subr.bf16.mxu0 %v5437_v36  ;;  %v2668_v6 = vrot.slane %v2663_v4, %v6021_v28  ;;  %v3001_v36 = vrot.slane %v2992_v57, %v6029_v30 }
 0x26c   :  { %2928 = vmatpush1.bf16.msra.mxu1 %v5361_v5 }
 0x26d   :  { %2929 = vmatprep.subr.bf16.mxu1 %v5366_v7  ;;  %4669 = vmatpush3.bf16.msra.mxu0 %v5438_v60  ;;  %v2203_v7 = vld [vmem:[%s6148_s15] sm:$0x3] }
 0x26e   :  { %4670 = vmatprep.subr.bf16.mxu0 %v5439_v62  ;;  %v2212_v11 = vrot.slane %v2203_v7, %v6029_v30 }
 0x270   :  { %2930 = vmatpush1.bf16.msra.mxu1 %v5364_v10 }
 0x271   :  { %3164 = vmatprep.subr.bf16.mxu1 %v5369_v12  ;;  %4671 = vmatpush3.bf16.msra.mxu0 %v5440_v63 }
 0x272   :  { %4672 = vmatprep.subr.bf16.mxu0 %v5441_v1 }
 0x273   :  { %4544 = vmatmul.mubr.msk.bf16.vlgmr.msra.gmra.mxu1 %vm2863_vm1, %v2624_v13  ;;  %v2672_v13 = vrot.slane %v2663_v4, %v6029_v30  ;;  %v5449_v30 = vld [vmem:[#allocation16 + $0x28] sm:$0xff]   ;;  %v5450_v4 = vld [vmem:[#allocation16 + $0x20] sm:$0xff]  }
 0x274   :  { %3165 = vmatpush1.bf16.msra.mxu1 %v5367_v14 }
 0x275   :  { %3166 = vmatprep.subr.bf16.mxu1 %v5372_v15  ;;  %4673 = vmatpush3.bf16.msra.mxu0 %v5442_v29 }
 0x276   :  { %4674 = vmatprep.subr.bf16.mxu0 %v5443_v54  ;;  %v5470_v54 = vld [vmem:[#allocation19] sm:$0xff]  }
 0x278   :  { %3167 = vmatpush1.bf16.msra.mxu1 %v5370_v16 }
 0x279   :  { %3168 = vmatprep.subr.bf16.mxu1 %v5375_v17  ;;  %4675 = vmatpush3.bf16.msra.mxu0 %v5444_v55  ;;  %v5478_v55 = vld [vmem:[#allocation17] sm:$0xff]  }
 0x27a   :  { %4676 = vmatprep.subr.bf16.mxu0 %v5445_v56  ;;  %v5479_v56 = vld [vmem:[#allocation20 + $0x78] sm:$0xff]  }
 0x27c   :  { %3169 = vmatpush1.bf16.msra.mxu1 %v5373_v18 }
 0x27d   :  { %3170 = vmatprep.subr.bf16.mxu1 %v5378_v19 }
 0x280   :  { %3171 = vmatpush1.bf16.msra.mxu1 %v5376_v22 }
 0x281   :  { %3172 = vmatprep.subr.bf16.mxu1 %v5381_v24 }
 0x284   :  { %3173 = vmatpush1.bf16.msra.mxu1 %v5379_v25 }
 0x285   :  { %3174 = vmatprep.subr.bf16.mxu1 %v5384_v26 }
 0x288   :  { %3175 = vmatpush1.bf16.msra.mxu1 %v5382_v27 }
 0x289   :  { %3176 = vmatprep.subr.bf16.mxu1 %v5387_v31 }
 0x28c   :  { %3177 = vmatpush1.bf16.msra.mxu1 %v5385_v34 }
 0x28d   :  { %3178 = vmatprep.subr.bf16.mxu1 %v5390_v38  ;;  %v5416_v38 = vld [vmem:[#allocation13 + $0x38] sm:$0xff]  }
 0x290   :  { %3179 = vmatpush1.bf16.msra.mxu1 %v5388_v39 }
 0x291   :  { %3180 = vmatprep.subr.bf16.mxu1 %v5393_v8  ;;  %v5417_v8 = vld [vmem:[#allocation13 + $0x70] sm:$0xff]  }
 0x294   :  { %3181 = vmatpush2.bf16.msra.mxu1 %v5391_v49 }
 0x295   :  { %3182 = vmatprep.subr.bf16.mxu1 %v5396_v9  ;;  %v5418_v9 = vld [vmem:[#allocation13 + $0x30] sm:$0xff]  }
 0x298   :  { %3183 = vmatpush2.bf16.msra.mxu1 %v5394_v52  ;;  %v5419_v52 = vld [vmem:[#allocation13 + $0x68] sm:$0xff]  }
 0x299   :  { %3184 = vmatprep.subr.bf16.mxu1 %v5399_v41  ;;  %v5420_v41 = vld [vmem:[#allocation13 + $0x28] sm:$0xff]  }
 0x29c   :  { %3185 = vmatpush2.bf16.msra.mxu1 %v5397_v42  ;;  %v5421_v42 = vld [vmem:[#allocation13 + $0x60] sm:$0xff]  }
 0x29d   :  { %3186 = vmatprep.subr.bf16.mxu1 %v5402_v20  ;;  %v5422_v20 = vld [vmem:[#allocation13 + $0x20] sm:$0xff]  }
 0x2a0   :  { %3187 = vmatpush2.bf16.msra.mxu1 %v5400_v43  ;;  %v5423_v43 = vld [vmem:[#allocation13 + $0x58] sm:$0xff]  }
 0x2a1   :  { %3188 = vmatprep.subr.bf16.mxu1 %v5405_v37  ;;  %v5425_v37 = vld [vmem:[#allocation13 + $0x50] sm:$0xff]  }
 0x2a4   :  { %3189 = vmatpush2.bf16.msra.mxu1 %v5403_v45  ;;  %v5426_v45 = vld [vmem:[#allocation13 + $0x10] sm:$0xff]  }
 0x2a5   :  { %3190 = vmatprep.subr.bf16.mxu1 %v5408_v48  ;;  %v5428_v48 = vld [vmem:[#allocation13 + $0x8] sm:$0xff]  }
 0x2a7   :  { %v6045_v21 = vpop.f32.mrf.mxu0 }
 0x2a8   :  { %3191 = vmatpush2.bf16.msra.mxu1 %v5406_v47 }
 0x2a9   :  { %v2571_v44 = vpop.f32.mrf.mxu0  ;;  %3192 = vmatprep.subr.bf16.mxu1 %v5411_v50 }
 0x2aa   :  { %v2572_v14 = vadd.f32 %v2571_v44, %v2212_v11  ;;  %v5424_v44 = vld [vmem:[#allocation13 + $0x18] sm:$0xff]  }
 0x2ab   :  { %v2573_v40 = vpop.f32.mrf.mxu0 }
 0x2ac   :  { %3193 = vmatpush2.bf16.msra.mxu1 %v5409_v51  ;;  %v2208_v40 = vrot.slane %v2203_v7, %v6021_v28  ;;  %v5429_v51 = vld [vmem:[#allocation13 + $0x40] sm:$0xff]   ;;  %v5448_v28 = vld [vmem:[#allocation16 + $0x30] sm:$0xff]  }
 0x2ad   :  { %v2574_v46 = vpop.f32.mrf.mxu0  ;;  %3194 = vmatprep.subr.bf16.mxu1 %v5414_v32  ;;  %v5430_v32 = vld [vmem:[#allocation13] sm:$0xff]  }
 0x2ae   :  { %v5427_v46 = vld [vmem:[#allocation13 + $0x48] sm:$0xff]   ;;  %v2570_v47 = vadd.f32 %v6045_v21, %v2208_v40  ;;  %v5446_v21 = vld [vmem:[#allocation14] sm:$0xff]  }
 0x2af   :  { %4677 = vmatpush3.bf16.msra.mxu0 %v5446_v21  ;;  %v5460_v40 = vld [vmem:[#allocation19 + $0x28] sm:$0xff]   ;;  %v4610_v21 = vld [vmem:[%s6129_s14] ss:$0 sm:$0xff] }
 0x2b0   :  { %3195 = vmatpush2.bf16.msra.mxu1 %v5412_v53  ;;  %4768 = vmatprep.subr.bf16.mxu0 %v5802_v33 }
 0x2b1   :  { %4684 = vmatprep.subr.bf16.mxu1 %v5415_v35 }
 0x2e7   :  { %v2908_v59 = vpop.f32.mrf.mxu0 }
 0x2e8   :  { %v2909_v12 = vadd.f32 %v2908_v59, %v2668_v6 }
 0x2e9   :  { %v2910_v61 = vpop.f32.mrf.mxu0 }
 0x2ea   :  { %v2911_v17 = vadd.f32 %v2910_v61, %v2672_v13  ;;  %v5452_v13 = vld [vmem:[#allocation16 + $0x10] sm:$0xff]  }
 0x2eb   :  { %v2912_v23 = vpop.f32.mrf.mxu0 }
 0x2ed   :  { %v2913_v0 = vpop.f32.mrf.mxu0 }
 0x327   :  { %v2610_v2 = vpop.f32.mrf.mxu1 }
 0x328   :  { %v2611_v50 = vadd.f32 %v2610_v2, %v2570_v47  ;;  %v5447_v2 = vld [vmem:[#allocation16 + $0x38] sm:$0xff]  }
 0x329   :  { %v2612_v3 = vpop.f32.mrf.mxu1  ;;  %v5463_v47 = vld [vmem:[#allocation19 + $0x58] sm:$0xff]  }
 0x32a   :  { %v2613_v16 = vadd.f32 %v2612_v3, %v2572_v14  ;;  %v2617_v53 = vmax.f32 %v2611_v50, 0.0  ;;  %v5453_v14 = vld [vmem:[#allocation16 + $0x8] sm:$0xff]   ;;  %v5465_v50 = vld [vmem:[#allocation19 + $0x50] sm:$0xff]  }
 0x32b   :  { %v2614_v5 = vpop.f32.mrf.mxu1 }
 0x32c   :  { %v2618_v26 = vmax.f32 %v2613_v16, 0.0  ;;  %v6061_v35 = vpack.c.bf16 %v2617_v53, %v2617_v53  ;;  %v5451_v5 = vld [vmem:[#allocation16 + $0x18] sm:$0xff]   ;;  %v5469_v53 = vld [vmem:[#allocation19 + $0x40] sm:$0xff]  }
 0x32d   :  { %v2615_v10 = vpop.f32.mrf.mxu1  ;;  %v5455_v16 = vld [vmem:[#allocation19 + $0x78] sm:$0xff]  }
 0x32e   :  { %v6056_v49 = vpack.c.bf16 %v2618_v26, %v2618_v26  ;;  %v5477_v26 = vld [vmem:[#allocation17 + $0x8] sm:$0xff]  }
 0x333   :  { %v2949_v15 = vpop.f32.mrf.mxu1 }
 0x334   :  { %v2950_v18 = vadd.f32 %v2949_v15, %v2909_v12  ;;  %v5454_v15 = vld [vmem:[#allocation16] sm:$0xff]  }
 0x335   :  { %v2951_v19 = vpop.f32.mrf.mxu1 }
 0x336   :  { %v2952_v22 = vadd.f32 %v2951_v19, %v2911_v17  ;;  %v2956_v24 = vmax.f32 %v2950_v18, 0.0  ;;  %v5471_v17 = vld [vmem:[#allocation17 + $0x38] sm:$0xff]   ;;  %v5472_v18 = vld [vmem:[#allocation17 + $0x30] sm:$0xff]   ;;  %v5473_v19 = vld [vmem:[#allocation17 + $0x28] sm:$0xff]  }
 0x337   :  { %v2953_v25 = vpop.f32.mrf.mxu1 }
 0x338   :  { %v2957_v27 = vmax.f32 %v2952_v22, 0.0  ;;  %v2958_v39 = vpack.c.bf16 %v2956_v24, %v2956_v24  ;;  %v5474_v22 = vld [vmem:[#allocation17 + $0x20] sm:$0xff]   ;;  %v5475_v24 = vld [vmem:[#allocation17 + $0x18] sm:$0xff]   ;;  %v5476_v25 = vld [vmem:[#allocation17 + $0x10] sm:$0xff]  }
 0x339   :  { %v2954_v31 = vpop.f32.mrf.mxu1 }
 0x33a   :  { %v2959_v34 = vpack.c.bf16 %v2957_v27, %v2957_v27 }
 0x33c   :  { %3196 = vmatprep.mubr.bf16.mxu1 %v2959_v34 }
 0x33d   :  { %3197 = vmatmul.mubr.bf16.vlgmr.msra.gmra.mxu1 %v2958_v39 }
 0x33e   :  { %4685 = vmatpush3.bf16.msra.mxu1 %v5416_v38  ;;  %3539 = vmatprep.mubr.bf16.mxu1 %v6056_v49  ;;  %v4609_v38 = vld [vmem:[%s6127_s12] ss:$0 sm:$0xff] }
 0x33f   :  { %4686 = vmatprep.subr.bf16.mxu1 %v5417_v8 }
 0x342   :  { %4687 = vmatpush3.bf16.msra.mxu1 %v5418_v9 }
 0x343   :  { %4688 = vmatprep.subr.bf16.mxu1 %v5419_v52 }
 0x346   :  { %4689 = vmatpush3.bf16.msra.mxu1 %v5420_v41 }
 0x347   :  { %4690 = vmatprep.subr.bf16.mxu1 %v5421_v42  ;;  %v5456_v42 = vld [vmem:[#allocation19 + $0x38] sm:$0xff]  }
 0x34a   :  { %4691 = vmatpush3.bf16.msra.mxu1 %v5422_v20 }
 0x34b   :  { %4692 = vmatprep.subr.bf16.mxu1 %v5423_v43  ;;  %v5457_v43 = vld [vmem:[#allocation19 + $0x70] sm:$0xff]  }
 0x34e   :  { %4693 = vmatpush3.bf16.msra.mxu1 %v5424_v44  ;;  %v5458_v44 = vld [vmem:[#allocation19 + $0x30] sm:$0xff]  }
 0x34f   :  { %4694 = vmatprep.subr.bf16.mxu1 %v5425_v37  ;;  %v5459_v37 = vld [vmem:[#allocation19 + $0x68] sm:$0xff]  }
 0x352   :  { %4695 = vmatpush3.bf16.msra.mxu1 %v5426_v45  ;;  %v5461_v45 = vld [vmem:[#allocation19 + $0x60] sm:$0xff]  }
 0x353   :  { %4696 = vmatprep.subr.bf16.mxu1 %v5427_v46  ;;  %v5462_v46 = vld [vmem:[#allocation19 + $0x20] sm:$0xff]  }
 0x356   :  { %4697 = vmatpush3.bf16.msra.mxu1 %v5428_v48  ;;  %v5464_v48 = vld [vmem:[#allocation19 + $0x18] sm:$0xff]  }
 0x357   :  { %4698 = vmatprep.subr.bf16.mxu1 %v5429_v51  ;;  %v5466_v51 = vld [vmem:[#allocation19 + $0x10] sm:$0xff]  }
 0x35a   :  { %4699 = vmatpush3.bf16.msra.mxu1 %v5430_v32  ;;  %v5467_v32 = vld [vmem:[#allocation19 + $0x48] sm:$0xff]  }
 0x35b   :  { %4788 = vmatprep.subr.bf16.mxu1 %v5802_v33 }
 0x35d   :  { %3540 = vmatmul.mubr.bf16.vlgmr.msra.gmra.mxu1 %v6061_v35 }
 0x35e   :  { %4804 = vmatprep.mubr.msk.bf16.mxu1 %vm5803_vm2, %v5802_v33  ;;  %4789 = vmatpush3.bf16.msra.mxu1 %v5471_v17 }
 0x35f   :  { %4790 = vmatprep.subr.bf16.mxu1 %v5802_v33 }
 0x362   :  { %4791 = vmatpush3.bf16.msra.mxu1 %v5472_v18 }
 0x363   :  { %4792 = vmatprep.subr.bf16.mxu1 %v5802_v33 }
 0x366   :  { %4793 = vmatpush3.bf16.msra.mxu1 %v5473_v19 }
 0x367   :  { %4794 = vmatprep.subr.bf16.mxu1 %v5802_v33 }
 0x36a   :  { %4795 = vmatpush3.bf16.msra.mxu1 %v5474_v22  ;;  %v4628_v22 = vld [vmem:[%s6133_s18] ss:$0 sm:$0xff] }
 0x36b   :  { %4796 = vmatprep.subr.bf16.mxu1 %v5802_v33 }
 0x36e   :  { %4797 = vmatpush3.bf16.msra.mxu1 %v5475_v24 }
 0x36f   :  { %4798 = vmatprep.subr.bf16.mxu1 %v5802_v33 }
 0x372   :  { %4799 = vmatpush3.bf16.msra.mxu1 %v5476_v25 }
 0x373   :  { %4800 = vmatprep.subr.bf16.mxu1 %v5802_v33 }
 0x376   :  { %4801 = vmatpush3.bf16.msra.mxu1 %v5477_v26 }
 0x377   :  { %4802 = vmatprep.subr.bf16.mxu1 %v5802_v33 }
 0x37a   :  { %4803 = vmatpush3.bf16.msra.mxu1 %v5478_v55 }
 0x37b   :  { %4746 = vmatprep.subr.bf16.mxu1 %v5479_v56 }
 0x3fd   :  { %v3198_v59 = vpop.f32.mrf.mxu1 }
 0x3fe   :  { %v3199_v60 = vadd.f32 %v3198_v59, %v2997_v58 }
 0x3ff   :  { %v3200_v61 = vpop.f32.mrf.mxu1 }
 0x400   :  { %v3201_v62 = vadd.f32 %v3200_v61, %v3001_v36  ;;  %v3205_v23 = vmax.f32 %v3199_v60, 0.0  ;;  %v5480_v60 = vld [vmem:[#allocation20 + $0x38] sm:$0xff]  }
 0x401   :  { %v3202_v63 = vpop.f32.mrf.mxu1 }
 0x402   :  { %v3206_v0 = vmax.f32 %v3201_v62, 0.0  ;;  %v6073_v3 = vpack.c.bf16 %v3205_v23, %v3205_v23  ;;  %v5481_v62 = vld [vmem:[#allocation20 + $0x70] sm:$0xff]   ;;  %v5483_v63 = vld [vmem:[#allocation20 + $0x68] sm:$0xff]  }
 0x403   :  { %v3203_v1 = vpop.f32.mrf.mxu1 }
 0x404   :  { %v6071_v29 = vpack.c.bf16 %v3206_v0, %v3206_v0  ;;  %v5484_v0 = vld [vmem:[#allocation20 + $0x28] sm:$0xff]   ;;  %v5485_v1 = vld [vmem:[#allocation20 + $0x60] sm:$0xff]  }
 0x406   :  { %3403 = vmatprep.mubr.bf16.mxu0 %v6071_v29 }
 0x407   :  { %3404 = vmatmul.mubr.bf16.vlgmr.msra.gmra.mxu0 %v6073_v3 }
 0x408   :  { %4769 = vmatpush3.bf16.msra.mxu0 %v5447_v2  ;;  %4784 = vmatprep.mubr.msk.bf16.mxu0 %vm5803_vm2, %v5802_v33  ;;  %v5486_v2 = vld [vmem:[#allocation20 + $0x20] sm:$0xff]  }
 0x409   :  { %4770 = vmatprep.subr.bf16.mxu0 %v5802_v33 }
 0x40c   :  { %4771 = vmatpush3.bf16.msra.mxu0 %v5448_v28  ;;  %v5487_v28 = vld [vmem:[#allocation20 + $0x58] sm:$0xff]  }
 0x40d   :  { %4772 = vmatprep.subr.bf16.mxu0 %v5802_v33 }
 0x410   :  { %4773 = vmatpush3.bf16.msra.mxu0 %v5449_v30  ;;  %v5488_v30 = vld [vmem:[#allocation20 + $0x18] sm:$0xff]  }
 0x411   :  { %4774 = vmatprep.subr.bf16.mxu0 %v5802_v33 }
 0x414   :  { %4775 = vmatpush3.bf16.msra.mxu0 %v5450_v4  ;;  %v5489_v4 = vld [vmem:[#allocation20 + $0x50] sm:$0xff]  }
 0x415   :  { %4776 = vmatprep.subr.bf16.mxu0 %v5802_v33 }
 0x418   :  { %4777 = vmatpush3.bf16.msra.mxu0 %v5451_v5  ;;  %v5490_v5 = vld [vmem:[#allocation20 + $0x10] sm:$0xff]  }
 0x419   :  { %4778 = vmatprep.subr.bf16.mxu0 %v5802_v33 }
 0x41c   :  { %4779 = vmatpush3.bf16.msra.mxu0 %v5452_v13 }
 0x41d   :  { %v4700_v6 = vpop.f32.mrf.mxu1  ;;  %4780 = vmatprep.subr.bf16.mxu0 %v5802_v33 }
 0x41f   :  { %v4701_v7 = vpop.f32.mrf.mxu1 }
 0x420   :  { %v4702_v10 = vadd.f32 %v4701_v7, %v4700_v6  ;;  %4781 = vmatpush3.bf16.msra.mxu0 %v5453_v14  ;;  %v5491_v6 = vld [vmem:[#allocation20 + $0x48] sm:$0xff]   ;;  %v5493_v7 = vld [vmem:[#allocation20 + $0x40] sm:$0xff]  }
 0x421   :  { %v4703_v11 = vpop.f32.mrf.mxu1  ;;  %4782 = vmatprep.subr.bf16.mxu0 %v5802_v33 }
 0x422   :  { %v5494_v11 = vld [vmem:[#allocation20] sm:$0xff]  }
 0x423   :  { %v4704_v12 = vpop.f32.mrf.mxu1 }
 0x424   :  { %4783 = vmatpush3.bf16.msra.mxu0 %v5454_v15 }
 0x425   :  { %4724 = vmatprep.subr.bf16.mxu0 %v5455_v16  ;;  %v4619_v16 = vld [vmem:[%s6131_s16] ss:$0 sm:$0xff]  ;;  %s5804_s16 = smov [#allocation22]  }
 0x426   :  { %s4170_s18 = sshll.u32 %s5804_s16, 4  ;;  %s4171_s18 = int_to_ptr.vmem [resolvable:$true] %s4170_s18 }
 0x427   :  { %p5752_p5 = scmp.lt.s32.totalorder %s4171_s18, %s4171_s18 }
 0x4c7   :  { %v4678_v27 = vpop.f32.mrf.mxu0 }
 0x4c9   :  { %v4679_v31 = vpop.f32.mrf.mxu0 }
 0x4ca   :  { %v4680_v34 = vadd.f32 %v4679_v31, %v4678_v27 }
 0x4cb   :  { %v4681_v39 = vpop.f32.mrf.mxu0 }
 0x4cc   :  { %v3542_v8 = vadd.f32 %v4702_v10, %v4680_v34 }
 0x4cd   :  { %v4682_v9 = vpop.f32.mrf.mxu0 }
 0x4ce   :  { %v3554_v52 = vadd.f32 %v4609_v38, %v3542_v8 }
 0x4d0   :  { %v3555_v41 = vmax.f32 %v3554_v52, 0.0 }
 0x4d2   :  { %v3556_v20 = vpack.c.bf16 %v3555_v41, %v3555_v41 }
 0x4d4   :  { %4785 = vmatmul.mubr.bf16.vlgmr.msra.gmra.mxu0 %v3556_v20 }
 0x4d5   :  { %4725 = vmatpush3.bf16.msra.mxu0 %v5456_v42  ;;  %3959 = vmatprep.mubr.bf16.mxu0 %v6056_v49  ;;  %v5468_v49 = vld [vmem:[#allocation19 + $0x8] sm:$0xff]  }
 0x4d6   :  { %4726 = vmatprep.subr.bf16.mxu0 %v5457_v43 }
 0x4d9   :  { %4727 = vmatpush3.bf16.msra.mxu0 %v5458_v44 }
 0x4da   :  { %4728 = vmatprep.subr.bf16.mxu0 %v5459_v37 }
 0x4dd   :  { %4729 = vmatpush3.bf16.msra.mxu0 %v5460_v40 }
 0x4de   :  { %4730 = vmatprep.subr.bf16.mxu0 %v5461_v45 }
 0x4e1   :  { %4731 = vmatpush3.bf16.msra.mxu0 %v5462_v46 }
 0x4e2   :  { %4732 = vmatprep.subr.bf16.mxu0 %v5463_v47 }
 0x4e5   :  { %4733 = vmatpush3.bf16.msra.mxu0 %v5464_v48 }
 0x4e6   :  { %4734 = vmatprep.subr.bf16.mxu0 %v5465_v50 }
 0x4e9   :  { %4735 = vmatpush3.bf16.msra.mxu0 %v5466_v51 }
 0x4ea   :  { %4736 = vmatprep.subr.bf16.mxu0 %v5467_v32 }
 0x4ed   :  { %4737 = vmatpush3.bf16.msra.mxu0 %v5468_v49 }
 0x4ee   :  { %4738 = vmatprep.subr.bf16.mxu0 %v5469_v53 }
 0x4f1   :  { %4739 = vmatpush3.bf16.msra.mxu0 %v5470_v54 }
 0x4f4   :  { %3960 = vmatmul.mubr.bf16.vlgmr.msra.gmra.mxu0 %v6061_v35  ;;  %v5482_v35 = vld [vmem:[#allocation20 + $0x30] sm:$0xff]  }
 0x594   :  { %v3662_v33 = vpop.f32.mrf.mxu0 }
 0x595   :  { %v3663_v57 = vadd.f32 %v4610_v21, %v3662_v33 }
 0x596   :  { %v4786_v58 = vpop.f32.mrf.mxu0 }
 0x597   :  { %v3668_v36 = vmax.f32 %v3663_v57, 0.0 }
 0x598   :  { %v3665_v59 = vpop.f32.mrf.mxu0 }
 0x599   :  { %v3669_v61 = vpack.c.bf16 %v3668_v36, %v3668_v36 }
 0x59a   :  { %v4787_v23 = vpop.f32.mrf.mxu0 }
 0x59b   :  { %4805 = vmatmul.mubr.bf16.vlgmr.msra.gmra.mxu1 %v3669_v61 }
 0x59c   :  { %4747 = vmatpush3.bf16.msra.mxu1 %v5480_v60  ;;  %4145 = vmatprep.mubr.bf16.mxu1 %v6071_v29  ;;  %v5492_v29 = vld [vmem:[#allocation20 + $0x8] sm:$0xff]  }
 0x59d   :  { %4748 = vmatprep.subr.bf16.mxu1 %v5481_v62 }
 0x5a0   :  { %4749 = vmatpush3.bf16.msra.mxu1 %v5482_v35 }
 0x5a1   :  { %4750 = vmatprep.subr.bf16.mxu1 %v5483_v63 }
 0x5a4   :  { %4751 = vmatpush3.bf16.msra.mxu1 %v5484_v0 }
 0x5a5   :  { %4752 = vmatprep.subr.bf16.mxu1 %v5485_v1 }
 0x5a8   :  { %4753 = vmatpush3.bf16.msra.mxu1 %v5486_v2 }
 0x5a9   :  { %4754 = vmatprep.subr.bf16.mxu1 %v5487_v28 }
 0x5ac   :  { %4755 = vmatpush3.bf16.msra.mxu1 %v5488_v30 }
 0x5ad   :  { %4756 = vmatprep.subr.bf16.mxu1 %v5489_v4 }
 0x5b0   :  { %4757 = vmatpush3.bf16.msra.mxu1 %v5490_v5 }
 0x5b1   :  { %4758 = vmatprep.subr.bf16.mxu1 %v5491_v6 }
 0x5b4   :  { %v4740_v10 = vpop.f32.mrf.mxu0  ;;  %4759 = vmatpush3.bf16.msra.mxu1 %v5492_v29 }
 0x5b5   :  { %4760 = vmatprep.subr.bf16.mxu1 %v5493_v7 }
 0x5b6   :  { %v4741_v12 = vpop.f32.mrf.mxu0 }
 0x5b7   :  { %v4742_v13 = vadd.f32 %v4741_v12, %v4740_v10 }
 0x5b8   :  { %v4743_v14 = vpop.f32.mrf.mxu0  ;;  %4761 = vmatpush3.bf16.msra.mxu1 %v5494_v11 }
 0x5b9   :  { %v3962_v25 = vadd.f32 %v4742_v13, %v4628_v22 }
 0x5ba   :  { %v4744_v15 = vpop.f32.mrf.mxu0 }
 0x5bb   :  { %4146 = vmatmul.mubr.bf16.vlgmr.msra.gmra.mxu1 %v6073_v3  ;;  %v4645_v3 = vld [vmem:[%s6135_s20] ss:$0 sm:$0xff]  ;;  %s5747_s20 = scalar_lea.vmem %s4171_s18, 384 }
 0x5bc   :  { %p5748_p4 = scmp.ne.s32.totalorder %s4171_s18, %s5747_s20  ;;  %p5753_p6 = scmp.lt.s32.totalorder %s5747_s20, %s5747_s20 }
 0x5be   :  { %p5754_p7 = por %p5753_p6, %p5752_p5 }
 0x5c0   :  { %p5755_p8 = pnand %p5754_p7, %p5748_p4 }
 0x65b   :  { %v3775_v17 = vpop.f32.mrf.mxu1 }
 0x65c   :  { %v3776_v18 = vadd.f32 %v4619_v16, %v3775_v17 }
 0x65d   :  { %v4806_v19 = vpop.f32.mrf.mxu1 }
 0x65e   :  { %3781 = vmax.xlane.f32.xlu0 %v3776_v18 }
 0x65f   :  { %v3778_v24 = vpop.f32.mrf.mxu1 }
 0x661   :  { %v4807_v26 = vpop.f32.mrf.mxu1 }
 0x662   :  { %3967 = vmax.xlane.f32.xlu0 %v3962_v25 }
 0x67b   :  { %v4762_v27 = vpop.f32.mrf.mxu1 }
 0x67d   :  { %v4763_v31 = vpop.f32.mrf.mxu1 }
 0x67e   :  { %v4764_v34 = vadd.f32 %v4763_v31, %v4762_v27 }
 0x67f   :  { %v4765_v38 = vpop.f32.mrf.mxu1 }
 0x680   :  { %v4148_v39 = vadd.f32 %v4764_v34, %v4645_v3 }
 0x681   :  { %v4766_v8 = vpop.f32.mrf.mxu1 }
 0x682   :  { %4153 = vmax.xlane.f32.xlu1 %v4148_v39 }
 0x6e7   :  { %v3782_v9 = vpop.xlane.xlu0 %3781 }
 0x6e8   :  { %v3783_v52 = vsub.f32 %v3776_v18, %v3782_v9 }
 0x6ea   :  { %v3784_v41 = vmul.f32 1.442695, %v3783_v52 }
 0x6eb   :  { %v3968_v42 = vpop.xlane.xlu0 %3967 }
 0x6ec   :  { %5495 = vpow2.f32 %v3784_v41  ;;  %v3969_v20 = vsub.f32 %v3962_v25, %v3968_v42 }
 0x6ee   :  { %v3970_v43 = vmul.f32 1.442695, %v3969_v20 }
 0x6f0   :  { %5497 = vpow2.f32 %v3970_v43 }
 0x6f9   :  { %v5496_v44 = vpop.eup %5495 }
 0x6fa   :  { %3786 = vadd.xlane.f32.xlu1 %v5496_v44 }
 0x6fd   :  { %v5498_v37 = vpop.eup %5497 }
 0x6fe   :  { %3972 = vadd.xlane.f32.xlu0 %v5498_v37 }
 0x70b   :  { %v4154_v40 = vpop.xlane.xlu1 %4153 }
 0x70c   :  { %v4155_v45 = vsub.f32 %v4148_v39, %v4154_v40 }
 0x70e   :  { %v4156_v46 = vmul.f32 1.442695, %v4155_v45 }
 0x710   :  { %5499 = vpow2.f32 %v4156_v46 }
 0x71d   :  { %v5500_v47 = vpop.eup %5499 }
 0x71e   :  { %4158 = vadd.xlane.f32.xlu1 %v5500_v47 }
 0x783   :  { %v3787_v48 = vpop.xlane.xlu1 %3786 }
 0x784   :  { %5501 = vlog2.f32 %v3787_v48 }
 0x787   :  { %v3973_v50 = vpop.xlane.xlu0 %3972 }
 0x788   :  { %5503 = vlog2.f32 %v3973_v50 }
 0x791   :  { %v5502_v51 = vpop.eup %5501 }
 0x792   :  { %v3789_v32 = vmul.f32 0.6931472, %v5502_v51 }
 0x794   :  { %v3790_v49 = vsub.f32 %v3783_v52, %v3789_v32 }
 0x795   :  { %v5504_v53 = vpop.eup %5503 }
 0x796   :  { %3791 = vst [vmem:[#allocation22] sm:$0xff] %v3790_v49  ;;  %v3975_v54 = vmul.f32 0.6931472, %v5504_v53 }
 0x798   :  { %v3976_v55 = vsub.f32 %v3969_v20, %v3975_v54 }
 0x79a   :  { %3977 = vst [vmem:[#allocation22 + $0x8] sm:$0xff] %v3976_v55 }
 0x7a7   :  { %v4159_v56 = vpop.xlane.xlu1 %4158 }
 0x7a8   :  { %5505 = vlog2.f32 %v4159_v56 }
 0x7b5   :  { %v5506_v21 = vpop.eup %5505 }
 0x7b6   :  { %v4161_v33 = vmul.f32 0.6931472, %v5506_v21 }
 0x7b8   :  { %v4162_v57 = vsub.f32 %v4155_v45, %v4161_v33 }
 0x7ba   :  { %4163 = vst [vmem:[#allocation22 + $0x10] sm:$0xff] %v4162_v57 }
 0x7bb   :  { %5758 = shalt.err (!%p5755_p8)
}
 0x7bc   :  { %4173 = dma.vmem_to_hbm [thread:$0]  %s4171_s18, 384, %s6136_s21, [#allocation4]  }
 0x7bd   :  { %5781 = dma.done.wait [#allocation4], 384  }
 0x7be   :  { %5782 = vsyncadd [#allocation4], 4294966912 }
 0x7bf   :  { %4177 = vsyncpa [#allocation3], 1 }
 0x7c0   :  { %4178 = vsyncpa [#allocation6], 1 }
 0x7c1   :  { %4179 = vsyncpa [#allocation9], 1 }
 0x7c2   :  { %4180 = vsyncpa [#allocation12], 1 }
 0x7c3   :  { %4181 = vsyncpa [#allocation15], 1 }
 0x7c4   :  { %4182 = vsyncpa [#allocation18], 1 }
 0x7c5   :  { %4183 = vsyncpa [#allocation21], 1 }
 0x7c6   :  { %4184 = vsyncpa [#allocation4], 1 }

</bundles_post_ra>
